<compile_context>
chip_gen: v7x
topology: tpu7x:2x2x1
jax: 0.10.0
libtpu: 0.0.40
codegen_flags: <defaults>
</compile_context>

<pallas_src>
import functools
import math

import jax
import jax.numpy as jnp
from jax.experimental import pallas as pl
from jax.experimental.pallas import tpu as pltpu

B, T, D, H, VOCAB, N_LAYERS = 2, 8, 32, 4, 64, 2
DH = D // H
MLP = 4 * D
EPS = 1e-5          # nn.LayerNorm default
NEG_BIG = -1e30     # finite "masked" value (avoids (-inf)-(-inf)=NaN)


# ----------------------------- in-kernel helpers ------------------------------
def _layernorm(x, g, b):
    mu = jnp.mean(x, axis=-1, keepdims=True)
    xc = x - mu
    var = jnp.mean(xc * xc, axis=-1, keepdims=True)
    return xc * jax.lax.rsqrt(var + EPS) * g + b


_GELU_C = math.sqrt(2.0 / math.pi)


def _gelu_tanh(x):
    # TODO(synk): torch nn.GELU default is the exact erf form; tanh approximation used
    # here (EUP-friendly, no native erf lowering). Validate tolerance vs. the reference.
    return 0.5 * x * (1.0 + jnp.tanh(_GELU_C * (x + 0.044715 * x * x * x)))


# ------------------------------ fused encoder kernel --------------------------
def make_encoder_kernel(n_layers_run, bsz, seq, dim, heads):
    bt = bsz * seq
    dh = dim // heads
    scale = 1.0 / math.sqrt(dh)

    def kernel(tok_ref, emb_ref, pos_ref,
               ln1_g_ref, ln1_b_ref, wqkv_ref, bqkv_ref, wo_ref, bo_ref,
               ln2_g_ref, ln2_b_ref, w1_ref, b1_ref, w2_ref, b2_ref,
               lnf_g_ref, lnf_b_ref, o_ref):
        f32 = jnp.float32
        bf16 = jnp.bfloat16

        # --- token embedding: one-hot @ table (exact, since one-hot is 0/1 f32) ---
        tok = tok_ref[...]                                                 # [bt, 1] i32
        vocab_ids = jax.lax.broadcasted_iota(jnp.int32, (bt, VOCAB), 1)
        onehot = (tok == vocab_ids).astype(f32)                            # [bt, VOCAB]
        x = jnp.dot(onehot, emb_ref[...], preferred_element_type=f32)
        x = x + pos_ref[...]                                               # [bt, dim]

        # --- combined causal + batch-block additive bias, built in-kernel ---
        row = jax.lax.broadcasted_iota(jnp.int32, (bt, bt), 0)
        col = jax.lax.broadcasted_iota(jnp.int32, (bt, bt), 1)
        row_batch = jax.lax.broadcasted_iota(
            jnp.int32, (bsz, seq, bt), 0).reshape(bt, bt)                  # r // seq
        ok = (col >= row_batch * seq) & (col <= row)                       # same batch & k<=q
        attn_bias = jnp.where(ok, 0.0, NEG_BIG).astype(f32)                # [bt, bt]

        # --- resblocks (statically unrolled; per-layer params stacked on axis 0) ---
        for l in range(n_layers_run):
            # multi-head self-attention (pre-LN)
            h = _layernorm(x, ln1_g_ref[l], ln1_b_ref[l])
            qkv = jnp.dot(h.astype(bf16), wqkv_ref[l].astype(bf16),
                          preferred_element_type=f32) + bqkv_ref[l]        # [bt, 3*dim]
            wo_l = wo_ref[l]                                               # [dim, dim]
            attn = jnp.zeros((bt, dim), f32)
            for hi in range(heads):
                q = qkv[:, hi * dh:(hi + 1) * dh] * scale
                k = qkv[:, dim + hi * dh:dim + (hi + 1) * dh]
                v = qkv[:, 2 * dim + hi * dh:2 * dim + (hi + 1) * dh]
                s = jax.lax.dot_general(q.astype(bf16), k.astype(bf16),
                                        (((1,), (1,)), ((), ())),
                                        preferred_element_type=f32)        # [bt, bt]
                s = s + attn_bias
                s = s - jnp.max(s, axis=-1, keepdims=True)
                p = jnp.exp(s)
                p = p / jnp.sum(p, axis=-1, keepdims=True)                 # f32 softmax
                ctx = jnp.dot(p.astype(bf16), v.astype(bf16),
                              preferred_element_type=f32)                  # [bt, dh]
                # fold this head's slice of the output projection (no lane concat)
                attn = attn + jnp.dot(ctx.astype(bf16),
                                      wo_l[hi * dh:(hi + 1) * dh, :].astype(bf16),
                                      preferred_element_type=f32)
            x = x + attn + bo_ref[l]

            # MLP (pre-LN)
            h2 = _layernorm(x, ln2_g_ref[l], ln2_b_ref[l])
            h2 = jnp.dot(h2.astype(bf16), w1_ref[l].astype(bf16),
                         preferred_element_type=f32) + b1_ref[l]
            h2 = _gelu_tanh(h2)
            h2 = jnp.dot(h2.astype(bf16), w2_ref[l].astype(bf16),
                         preferred_element_type=f32) + b2_ref[l]
            x = x + h2

        # --- ln_final + store (splitting the leading dim only; a trivial relayout) ---
        x = _layernorm(x, lnf_g_ref[...], lnf_b_ref[...])
        o_ref[...] = x.reshape(bsz, seq, dim).astype(o_ref.dtype)

    return kernel


# --------------------------------- wrapper ------------------------------------
@functools.partial(jax.jit, static_argnames=("layer",))
def openclip_encode(tokens, params, layer="last"):
    assert layer in ("last", "penultimate")
    bsz, seq = tokens.shape
    n_run = N_LAYERS if layer == "last" else N_LAYERS - 1

    tok2 = tokens.reshape(bsz * seq, 1).astype(jnp.int32)
    pos = jnp.tile(params["pos_emb"], (bsz, 1))                            # [bsz*seq, D]
    # stack each of the 12 per-layer params along a leading layer axis
    stacked = [jnp.stack([blk[i] for blk in params["blocks"]]) for i in range(12)]

    vmem = pl.BlockSpec(memory_space=pltpu.MemorySpace.VMEM)
    kernel = make_encoder_kernel(n_run, bsz, seq, D, H)
    x = pl.pallas_call(
        kernel,
        out_shape=jax.ShapeDtypeStruct((bsz, seq, D), jnp.float32),
        in_specs=[vmem] * 17,
        out_specs=vmem,
    )(tok2, params["tok_emb"], pos, *stacked,
      params["ln_f_g"], params["ln_f_b"])

    # legacy=True path: ln_final already applied in-kernel; mask of ones
    mask = jnp.ones((bsz, seq), dtype=x.dtype)
    return x, mask[:, None, None, :]


# ------------------------------ parameter setup --------------------------------
class _KeyGen:
    def __init__(self, key):
        self._key = key

    def __call__(self):
        self._key, sub = jax.random.split(self._key)
        return sub


def init_params(key):
    kg = _KeyGen(key)

    def nrm(shape, s=0.02):
        return (s * jax.random.normal(kg(), shape)).astype(jnp.float32)

    params = {
        "tok_emb": nrm((VOCAB, D)),
        "pos_emb": nrm((T, D), 0.01),
        "ln_f_g": jnp.ones((1, D), jnp.float32),
        "ln_f_b": nrm((1, D), 0.01),
        "blocks": [],
    }
    for _ in range(N_LAYERS):
        blk = (
            jnp.ones((1, D), jnp.float32),     # ln1 gamma
            nrm((1, D), 0.01),                 # ln1 beta
            nrm((D, 3 * D)),                   # attn in_proj weight (transposed)
            nrm((1, 3 * D), 0.01),             # attn in_proj bias
            nrm((D, D)),                       # attn out_proj weight (transposed)
            nrm((1, D), 0.01),                 # attn out_proj bias
            jnp.ones((1, D), jnp.float32),     # ln2 gamma
            nrm((1, D), 0.01),                 # ln2 beta
            nrm((D, MLP)),                     # mlp c_fc weight (transposed)
            nrm((1, MLP), 0.01),               # mlp c_fc bias
            nrm((MLP, D)),                     # mlp c_proj weight (transposed)
            nrm((1, D), 0.01),                 # mlp c_proj bias
        )
        params["blocks"].append(blk)
    return params


# ----------------------------------- main ---------------------------------------
if __name__ == "__main__":
    key = jax.random.PRNGKey(0)
    k_tok, k_par = jax.random.split(key)
    tokens = jax.random.randint(k_tok, (B, T), 0, VOCAB, dtype=jnp.int32)
    params = init_params(k_par)

    out, out_mask = openclip_encode(tokens, params, layer="last")
    out = jax.block_until_ready(out)
    out_mask = jax.block_until_ready(out_mask)

    assert out.shape == (B, T, D)
    assert out_mask.shape == (B, 1, 1, T)
    assert bool(jnp.all(jnp.isfinite(out)))
    print("KERNEL_OK")
</pallas_src>

<mosaic_0001>
module attributes {stable_mosaic.version = 11 : i64} {
  func.func @kernel(%arg0: memref<16x1xi32, #tpu.memory_space<vmem>>, %arg1: memref<64x32xf32, #tpu.memory_space<vmem>>, %arg2: memref<16x32xf32, #tpu.memory_space<vmem>>, %arg3: memref<2x1x32xf32, #tpu.memory_space<vmem>>, %arg4: memref<2x1x32xf32, #tpu.memory_space<vmem>>, %arg5: memref<2x32x96xf32, #tpu.memory_space<vmem>>, %arg6: memref<2x1x96xf32, #tpu.memory_space<vmem>>, %arg7: memref<2x32x32xf32, #tpu.memory_space<vmem>>, %arg8: memref<2x1x32xf32, #tpu.memory_space<vmem>>, %arg9: memref<2x1x32xf32, #tpu.memory_space<vmem>>, %arg10: memref<2x1x32xf32, #tpu.memory_space<vmem>>, %arg11: memref<2x32x128xf32, #tpu.memory_space<vmem>>, %arg12: memref<2x1x128xf32, #tpu.memory_space<vmem>>, %arg13: memref<2x128x32xf32, #tpu.memory_space<vmem>>, %arg14: memref<2x1x32xf32, #tpu.memory_space<vmem>>, %arg15: memref<1x32xf32, #tpu.memory_space<vmem>>, %arg16: memref<1x32xf32, #tpu.memory_space<vmem>>, %arg17: memref<2x8x32xf32, #tpu.memory_space<vmem>>) attributes {dimension_semantics = [], scalar_prefetch = 0 : i64, scratch_operands = 0 : i64, tpu.core_type = #tpu.core_type<tc>} {
    %c0 = arith.constant 0 : index
    %c0_0 = arith.constant 0 : index
    %0 = vector.load %arg0[%c0, %c0_0] : memref<16x1xi32, #tpu.memory_space<vmem>>, vector<16x1xi32>
    %1 = tpu.iota {dimensions = array<i32: 1>} : vector<16x64xi32>
    %2 = vector.broadcast %0 : vector<16x1xi32> to vector<16x64xi32>
    %3 = arith.cmpi eq, %2, %1 : vector<16x64xi32>
    %4 = arith.extui %3 : vector<16x64xi1> to vector<16x64xi32>
    %5 = arith.sitofp %4 : vector<16x64xi32> to vector<16x64xf32>
    %c0_1 = arith.constant 0 : index
    %c0_2 = arith.constant 0 : index
    %6 = vector.load %arg1[%c0_1, %c0_2] : memref<64x32xf32, #tpu.memory_space<vmem>>, vector<64x32xf32>
    %cst = arith.constant dense<0.000000e+00> : vector<16x32xf32>
    %7 = tpu.matmul %5, %6, %cst {dimension_numbers = #tpu.dot_dimension_numbers<[1], [0], [0], [1], [0, 0, 1, 1], [], []>} : vector<16x64xf32>, vector<64x32xf32>, vector<16x32xf32> -> vector<16x32xf32>
    %c0_3 = arith.constant 0 : index
    %c0_4 = arith.constant 0 : index
    %8 = vector.load %arg2[%c0_3, %c0_4] : memref<16x32xf32, #tpu.memory_space<vmem>>, vector<16x32xf32>
    %9 = arith.addf %7, %8 : vector<16x32xf32>
    %10 = tpu.iota {dimensions = array<i32: 0>} : vector<16x16xi32>
    %11 = tpu.iota {dimensions = array<i32: 1>} : vector<16x16xi32>
    %12 = tpu.iota {dimensions = array<i32: 0>} : vector<2x8x16xi32>
    %13 = vector.shape_cast %12 : vector<2x8x16xi32> to vector<16x16xi32>
    %c8_i32 = arith.constant 8 : i32
    %14 = vector.broadcast %c8_i32 : i32 to vector<16x16xi32>
    %15 = arith.muli %13, %14 : vector<16x16xi32>
    %16 = arith.cmpi sge, %11, %15 : vector<16x16xi32>
    %17 = arith.cmpi sle, %11, %10 : vector<16x16xi32>
    %18 = arith.andi %16, %17 : vector<16x16xi1>
    %cst_5 = arith.constant 0.000000e+00 : f32
    %cst_6 = arith.constant -1.000000e+30 : f32
    %19 = vector.broadcast %cst_5 : f32 to vector<16x16xf32>
    %20 = vector.broadcast %cst_6 : f32 to vector<16x16xf32>
    %21 = arith.select %18, %19, %20 : vector<16x16xi1>, vector<16x16xf32>
    %c0_7 = arith.constant 0 : index
    %c0_8 = arith.constant 0 : index
    %c0_9 = arith.constant 0 : index
    %22 = vector.load %arg3[%c0_7, %c0_8, %c0_9] : memref<2x1x32xf32, #tpu.memory_space<vmem>>, vector<1x1x32xf32>
    %23 = vector.shape_cast %22 : vector<1x1x32xf32> to vector<1x32xf32>
    %c0_10 = arith.constant 0 : index
    %c0_11 = arith.constant 0 : index
    %c0_12 = arith.constant 0 : index
    %24 = vector.load %arg4[%c0_10, %c0_11, %c0_12] : memref<2x1x32xf32, #tpu.memory_space<vmem>>, vector<1x1x32xf32>
    %25 = vector.shape_cast %24 : vector<1x1x32xf32> to vector<1x32xf32>
    %cst_13 = arith.constant dense<0.000000e+00> : vector<16xf32>
    %26 = vector.multi_reduction <add>, %9, %cst_13 [1] : vector<16x32xf32> to vector<16xf32>
    %27 = vector.shape_cast %26 : vector<16xf32> to vector<16x1xf32>
    %cst_14 = arith.constant 3.200000e+01 : f32
    %28 = vector.broadcast %cst_14 : f32 to vector<16x1xf32>
    %29 = arith.divf %27, %28 : vector<16x1xf32>
    %30 = vector.broadcast %29 : vector<16x1xf32> to vector<16x32xf32>
    %31 = arith.subf %9, %30 : vector<16x32xf32>
    %32 = arith.mulf %31, %31 : vector<16x32xf32>
    %cst_15 = arith.constant dense<0.000000e+00> : vector<16xf32>
    %33 = vector.multi_reduction <add>, %32, %cst_15 [1] : vector<16x32xf32> to vector<16xf32>
    %34 = vector.shape_cast %33 : vector<16xf32> to vector<16x1xf32>
    %cst_16 = arith.constant 3.200000e+01 : f32
    %35 = vector.broadcast %cst_16 : f32 to vector<16x1xf32>
    %36 = arith.divf %34, %35 : vector<16x1xf32>
    %cst_17 = arith.constant 9.99999974E-6 : f32
    %37 = vector.broadcast %cst_17 : f32 to vector<16x1xf32>
    %38 = arith.addf %36, %37 : vector<16x1xf32>
    %39 = math.rsqrt %38 : vector<16x1xf32>
    %40 = vector.broadcast %39 : vector<16x1xf32> to vector<16x32xf32>
    %41 = arith.mulf %31, %40 : vector<16x32xf32>
    %42 = vector.broadcast %23 : vector<1x32xf32> to vector<16x32xf32>
    %43 = arith.mulf %41, %42 : vector<16x32xf32>
    %44 = vector.broadcast %25 : vector<1x32xf32> to vector<16x32xf32>
    %45 = arith.addf %43, %44 : vector<16x32xf32>
    %46 = arith.truncf %45 : vector<16x32xf32> to vector<16x32xbf16>
    %c0_18 = arith.constant 0 : index
    %c0_19 = arith.constant 0 : index
    %c0_20 = arith.constant 0 : index
    %47 = vector.load %arg5[%c0_18, %c0_19, %c0_20] : memref<2x32x96xf32, #tpu.memory_space<vmem>>, vector<1x32x96xf32>
    %48 = vector.shape_cast %47 : vector<1x32x96xf32> to vector<32x96xf32>
    %49 = arith.truncf %48 : vector<32x96xf32> to vector<32x96xbf16>
    %cst_21 = arith.constant dense<0.000000e+00> : vector<16x96xf32>
    %50 = tpu.matmul %46, %49, %cst_21 {dimension_numbers = #tpu.dot_dimension_numbers<[1], [0], [0], [1], [0, 0, 1, 1], [], []>} : vector<16x32xbf16>, vector<32x96xbf16>, vector<16x96xf32> -> vector<16x96xf32>
    %c0_22 = arith.constant 0 : index
    %c0_23 = arith.constant 0 : index
    %c0_24 = arith.constant 0 : index
    %51 = vector.load %arg6[%c0_22, %c0_23, %c0_24] : memref<2x1x96xf32, #tpu.memory_space<vmem>>, vector<1x1x96xf32>
    %52 = vector.shape_cast %51 : vector<1x1x96xf32> to vector<1x96xf32>
    %53 = vector.broadcast %52 : vector<1x96xf32> to vector<16x96xf32>
    %54 = arith.addf %50, %53 : vector<16x96xf32>
    %c0_25 = arith.constant 0 : index
    %c0_26 = arith.constant 0 : index
    %c0_27 = arith.constant 0 : index
    %55 = vector.load %arg7[%c0_25, %c0_26, %c0_27] : memref<2x32x32xf32, #tpu.memory_space<vmem>>, vector<1x32x32xf32>
    %56 = vector.shape_cast %55 : vector<1x32x32xf32> to vector<32x32xf32>
    %cst_28 = arith.constant 0.000000e+00 : f32
    %57 = vector.broadcast %cst_28 : f32 to vector<16x32xf32>
    %58 = vector.extract_strided_slice %54 {offsets = [0, 0], sizes = [16, 8], strides = [1, 1]} : vector<16x96xf32> to vector<16x8xf32>
    %cst_29 = arith.constant 0.353553385 : f32
    %59 = vector.broadcast %cst_29 : f32 to vector<16x8xf32>
    %60 = arith.mulf %58, %59 : vector<16x8xf32>
    %61 = vector.extract_strided_slice %54 {offsets = [0, 32], sizes = [16, 8], strides = [1, 1]} : vector<16x96xf32> to vector<16x8xf32>
    %62 = vector.extract_strided_slice %54 {offsets = [0, 64], sizes = [16, 8], strides = [1, 1]} : vector<16x96xf32> to vector<16x8xf32>
    %63 = arith.truncf %60 : vector<16x8xf32> to vector<16x8xbf16>
    %64 = arith.truncf %61 : vector<16x8xf32> to vector<16x8xbf16>
    %cst_30 = arith.constant dense<0.000000e+00> : vector<16x16xf32>
    %65 = tpu.matmul %63, %64, %cst_30 {dimension_numbers = #tpu.dot_dimension_numbers<[1], [1], [0], [0], [0, 0, 1, 0], [], []>} : vector<16x8xbf16>, vector<16x8xbf16>, vector<16x16xf32> -> vector<16x16xf32>
    %66 = arith.addf %65, %21 : vector<16x16xf32>
    %cst_31 = arith.constant dense<0xFF800000> : vector<16xf32>
    %67 = vector.multi_reduction <maximumf>, %66, %cst_31 [1] : vector<16x16xf32> to vector<16xf32>
    %68 = vector.shape_cast %67 : vector<16xf32> to vector<16x1xf32>
    %69 = vector.broadcast %68 : vector<16x1xf32> to vector<16x16xf32>
    %70 = arith.subf %66, %69 : vector<16x16xf32>
    %71 = math.exp %70 : vector<16x16xf32>
    %cst_32 = arith.constant dense<0.000000e+00> : vector<16xf32>
    %72 = vector.multi_reduction <add>, %71, %cst_32 [1] : vector<16x16xf32> to vector<16xf32>
    %73 = vector.shape_cast %72 : vector<16xf32> to vector<16x1xf32>
    %74 = vector.broadcast %73 : vector<16x1xf32> to vector<16x16xf32>
    %75 = arith.divf %71, %74 : vector<16x16xf32>
    %76 = arith.truncf %75 : vector<16x16xf32> to vector<16x16xbf16>
    %77 = arith.truncf %62 : vector<16x8xf32> to vector<16x8xbf16>
    %cst_33 = arith.constant dense<0.000000e+00> : vector<16x8xf32>
    %78 = tpu.matmul %76, %77, %cst_33 {dimension_numbers = #tpu.dot_dimension_numbers<[1], [0], [0], [1], [0, 0, 1, 1], [], []>} : vector<16x16xbf16>, vector<16x8xbf16>, vector<16x8xf32> -> vector<16x8xf32>
    %79 = arith.truncf %78 : vector<16x8xf32> to vector<16x8xbf16>
    %80 = vector.extract_strided_slice %56 {offsets = [0, 0], sizes = [8, 32], strides = [1, 1]} : vector<32x32xf32> to vector<8x32xf32>
    %81 = arith.truncf %80 : vector<8x32xf32> to vector<8x32xbf16>
    %cst_34 = arith.constant dense<0.000000e+00> : vector<16x32xf32>
    %82 = tpu.matmul %79, %81, %cst_34 {dimension_numbers = #tpu.dot_dimension_numbers<[1], [0], [0], [1], [0, 0, 1, 1], [], []>} : vector<16x8xbf16>, vector<8x32xbf16>, vector<16x32xf32> -> vector<16x32xf32>
    %83 = arith.addf %57, %82 : vector<16x32xf32>
    %84 = vector.extract_strided_slice %54 {offsets = [0, 8], sizes = [16, 8], strides = [1, 1]} : vector<16x96xf32> to vector<16x8xf32>
    %cst_35 = arith.constant 0.353553385 : f32
    %85 = vector.broadcast %cst_35 : f32 to vector<16x8xf32>
    %86 = arith.mulf %84, %85 : vector<16x8xf32>
    %87 = vector.extract_strided_slice %54 {offsets = [0, 40], sizes = [16, 8], strides = [1, 1]} : vector<16x96xf32> to vector<16x8xf32>
    %88 = vector.extract_strided_slice %54 {offsets = [0, 72], sizes = [16, 8], strides = [1, 1]} : vector<16x96xf32> to vector<16x8xf32>
    %89 = arith.truncf %86 : vector<16x8xf32> to vector<16x8xbf16>
    %90 = arith.truncf %87 : vector<16x8xf32> to vector<16x8xbf16>
    %cst_36 = arith.constant dense<0.000000e+00> : vector<16x16xf32>
    %91 = tpu.matmul %89, %90, %cst_36 {dimension_numbers = #tpu.dot_dimension_numbers<[1], [1], [0], [0], [0, 0, 1, 0], [], []>} : vector<16x8xbf16>, vector<16x8xbf16>, vector<16x16xf32> -> vector<16x16xf32>
    %92 = arith.addf %91, %21 : vector<16x16xf32>
    %cst_37 = arith.constant dense<0xFF800000> : vector<16xf32>
    %93 = vector.multi_reduction <maximumf>, %92, %cst_37 [1] : vector<16x16xf32> to vector<16xf32>
    %94 = vector.shape_cast %93 : vector<16xf32> to vector<16x1xf32>
    %95 = vector.broadcast %94 : vector<16x1xf32> to vector<16x16xf32>
    %96 = arith.subf %92, %95 : vector<16x16xf32>
    %97 = math.exp %96 : vector<16x16xf32>
    %cst_38 = arith.constant dense<0.000000e+00> : vector<16xf32>
    %98 = vector.multi_reduction <add>, %97, %cst_38 [1] : vector<16x16xf32> to vector<16xf32>
    %99 = vector.shape_cast %98 : vector<16xf32> to vector<16x1xf32>
    %100 = vector.broadcast %99 : vector<16x1xf32> to vector<16x16xf32>
    %101 = arith.divf %97, %100 : vector<16x16xf32>
    %102 = arith.truncf %101 : vector<16x16xf32> to vector<16x16xbf16>
    %103 = arith.truncf %88 : vector<16x8xf32> to vector<16x8xbf16>
    %cst_39 = arith.constant dense<0.000000e+00> : vector<16x8xf32>
    %104 = tpu.matmul %102, %103, %cst_39 {dimension_numbers = #tpu.dot_dimension_numbers<[1], [0], [0], [1], [0, 0, 1, 1], [], []>} : vector<16x16xbf16>, vector<16x8xbf16>, vector<16x8xf32> -> vector<16x8xf32>
    %105 = arith.truncf %104 : vector<16x8xf32> to vector<16x8xbf16>
    %106 = vector.extract_strided_slice %56 {offsets = [8, 0], sizes = [8, 32], strides = [1, 1]} : vector<32x32xf32> to vector<8x32xf32>
    %107 = arith.truncf %106 : vector<8x32xf32> to vector<8x32xbf16>
    %cst_40 = arith.constant dense<0.000000e+00> : vector<16x32xf32>
    %108 = tpu.matmul %105, %107, %cst_40 {dimension_numbers = #tpu.dot_dimension_numbers<[1], [0], [0], [1], [0, 0, 1, 1], [], []>} : vector<16x8xbf16>, vector<8x32xbf16>, vector<16x32xf32> -> vector<16x32xf32>
    %109 = arith.addf %83, %108 : vector<16x32xf32>
    %110 = vector.extract_strided_slice %54 {offsets = [0, 16], sizes = [16, 8], strides = [1, 1]} : vector<16x96xf32> to vector<16x8xf32>
    %cst_41 = arith.constant 0.353553385 : f32
    %111 = vector.broadcast %cst_41 : f32 to vector<16x8xf32>
    %112 = arith.mulf %110, %111 : vector<16x8xf32>
    %113 = vector.extract_strided_slice %54 {offsets = [0, 48], sizes = [16, 8], strides = [1, 1]} : vector<16x96xf32> to vector<16x8xf32>
    %114 = vector.extract_strided_slice %54 {offsets = [0, 80], sizes = [16, 8], strides = [1, 1]} : vector<16x96xf32> to vector<16x8xf32>
    %115 = arith.truncf %112 : vector<16x8xf32> to vector<16x8xbf16>
    %116 = arith.truncf %113 : vector<16x8xf32> to vector<16x8xbf16>
    %cst_42 = arith.constant dense<0.000000e+00> : vector<16x16xf32>
    %117 = tpu.matmul %115, %116, %cst_42 {dimension_numbers = #tpu.dot_dimension_numbers<[1], [1], [0], [0], [0, 0, 1, 0], [], []>} : vector<16x8xbf16>, vector<16x8xbf16>, vector<16x16xf32> -> vector<16x16xf32>
    %118 = arith.addf %117, %21 : vector<16x16xf32>
    %cst_43 = arith.constant dense<0xFF800000> : vector<16xf32>
    %119 = vector.multi_reduction <maximumf>, %118, %cst_43 [1] : vector<16x16xf32> to vector<16xf32>
    %120 = vector.shape_cast %119 : vector<16xf32> to vector<16x1xf32>
    %121 = vector.broadcast %120 : vector<16x1xf32> to vector<16x16xf32>
    %122 = arith.subf %118, %121 : vector<16x16xf32>
    %123 = math.exp %122 : vector<16x16xf32>
    %cst_44 = arith.constant dense<0.000000e+00> : vector<16xf32>
    %124 = vector.multi_reduction <add>, %123, %cst_44 [1] : vector<16x16xf32> to vector<16xf32>
    %125 = vector.shape_cast %124 : vector<16xf32> to vector<16x1xf32>
    %126 = vector.broadcast %125 : vector<16x1xf32> to vector<16x16xf32>
    %127 = arith.divf %123, %126 : vector<16x16xf32>
    %128 = arith.truncf %127 : vector<16x16xf32> to vector<16x16xbf16>
    %129 = arith.truncf %114 : vector<16x8xf32> to vector<16x8xbf16>
    %cst_45 = arith.constant dense<0.000000e+00> : vector<16x8xf32>
    %130 = tpu.matmul %128, %129, %cst_45 {dimension_numbers = #tpu.dot_dimension_numbers<[1], [0], [0], [1], [0, 0, 1, 1], [], []>} : vector<16x16xbf16>, vector<16x8xbf16>, vector<16x8xf32> -> vector<16x8xf32>
    %131 = arith.truncf %130 : vector<16x8xf32> to vector<16x8xbf16>
    %132 = vector.extract_strided_slice %56 {offsets = [16, 0], sizes = [8, 32], strides = [1, 1]} : vector<32x32xf32> to vector<8x32xf32>
    %133 = arith.truncf %132 : vector<8x32xf32> to vector<8x32xbf16>
    %cst_46 = arith.constant dense<0.000000e+00> : vector<16x32xf32>
    %134 = tpu.matmul %131, %133, %cst_46 {dimension_numbers = #tpu.dot_dimension_numbers<[1], [0], [0], [1], [0, 0, 1, 1], [], []>} : vector<16x8xbf16>, vector<8x32xbf16>, vector<16x32xf32> -> vector<16x32xf32>
    %135 = arith.addf %109, %134 : vector<16x32xf32>
    %136 = vector.extract_strided_slice %54 {offsets = [0, 24], sizes = [16, 8], strides = [1, 1]} : vector<16x96xf32> to vector<16x8xf32>
    %cst_47 = arith.constant 0.353553385 : f32
    %137 = vector.broadcast %cst_47 : f32 to vector<16x8xf32>
    %138 = arith.mulf %136, %137 : vector<16x8xf32>
    %139 = vector.extract_strided_slice %54 {offsets = [0, 56], sizes = [16, 8], strides = [1, 1]} : vector<16x96xf32> to vector<16x8xf32>
    %140 = vector.extract_strided_slice %54 {offsets = [0, 88], sizes = [16, 8], strides = [1, 1]} : vector<16x96xf32> to vector<16x8xf32>
    %141 = arith.truncf %138 : vector<16x8xf32> to vector<16x8xbf16>
    %142 = arith.truncf %139 : vector<16x8xf32> to vector<16x8xbf16>
    %cst_48 = arith.constant dense<0.000000e+00> : vector<16x16xf32>
    %143 = tpu.matmul %141, %142, %cst_48 {dimension_numbers = #tpu.dot_dimension_numbers<[1], [1], [0], [0], [0, 0, 1, 0], [], []>} : vector<16x8xbf16>, vector<16x8xbf16>, vector<16x16xf32> -> vector<16x16xf32>
    %144 = arith.addf %143, %21 : vector<16x16xf32>
    %cst_49 = arith.constant dense<0xFF800000> : vector<16xf32>
    %145 = vector.multi_reduction <maximumf>, %144, %cst_49 [1] : vector<16x16xf32> to vector<16xf32>
    %146 = vector.shape_cast %145 : vector<16xf32> to vector<16x1xf32>
    %147 = vector.broadcast %146 : vector<16x1xf32> to vector<16x16xf32>
    %148 = arith.subf %144, %147 : vector<16x16xf32>
    %149 = math.exp %148 : vector<16x16xf32>
    %cst_50 = arith.constant dense<0.000000e+00> : vector<16xf32>
    %150 = vector.multi_reduction <add>, %149, %cst_50 [1] : vector<16x16xf32> to vector<16xf32>
    %151 = vector.shape_cast %150 : vector<16xf32> to vector<16x1xf32>
    %152 = vector.broadcast %151 : vector<16x1xf32> to vector<16x16xf32>
    %153 = arith.divf %149, %152 : vector<16x16xf32>
    %154 = arith.truncf %153 : vector<16x16xf32> to vector<16x16xbf16>
    %155 = arith.truncf %140 : vector<16x8xf32> to vector<16x8xbf16>
    %cst_51 = arith.constant dense<0.000000e+00> : vector<16x8xf32>
    %156 = tpu.matmul %154, %155, %cst_51 {dimension_numbers = #tpu.dot_dimension_numbers<[1], [0], [0], [1], [0, 0, 1, 1], [], []>} : vector<16x16xbf16>, vector<16x8xbf16>, vector<16x8xf32> -> vector<16x8xf32>
    %157 = arith.truncf %156 : vector<16x8xf32> to vector<16x8xbf16>
    %158 = vector.extract_strided_slice %56 {offsets = [24, 0], sizes = [8, 32], strides = [1, 1]} : vector<32x32xf32> to vector<8x32xf32>
    %159 = arith.truncf %158 : vector<8x32xf32> to vector<8x32xbf16>
    %cst_52 = arith.constant dense<0.000000e+00> : vector<16x32xf32>
    %160 = tpu.matmul %157, %159, %cst_52 {dimension_numbers = #tpu.dot_dimension_numbers<[1], [0], [0], [1], [0, 0, 1, 1], [], []>} : vector<16x8xbf16>, vector<8x32xbf16>, vector<16x32xf32> -> vector<16x32xf32>
    %161 = arith.addf %135, %160 : vector<16x32xf32>
    %162 = arith.addf %9, %161 : vector<16x32xf32>
    %c0_53 = arith.constant 0 : index
    %c0_54 = arith.constant 0 : index
    %c0_55 = arith.constant 0 : index
    %163 = vector.load %arg8[%c0_53, %c0_54, %c0_55] : memref<2x1x32xf32, #tpu.memory_space<vmem>>, vector<1x1x32xf32>
    %164 = vector.shape_cast %163 : vector<1x1x32xf32> to vector<1x32xf32>
    %165 = vector.broadcast %164 : vector<1x32xf32> to vector<16x32xf32>
    %166 = arith.addf %162, %165 : vector<16x32xf32>
    %c0_56 = arith.constant 0 : index
    %c0_57 = arith.constant 0 : index
    %c0_58 = arith.constant 0 : index
    %167 = vector.load %arg9[%c0_56, %c0_57, %c0_58] : memref<2x1x32xf32, #tpu.memory_space<vmem>>, vector<1x1x32xf32>
    %168 = vector.shape_cast %167 : vector<1x1x32xf32> to vector<1x32xf32>
    %c0_59 = arith.constant 0 : index
    %c0_60 = arith.constant 0 : index
    %c0_61 = arith.constant 0 : index
    %169 = vector.load %arg10[%c0_59, %c0_60, %c0_61] : memref<2x1x32xf32, #tpu.memory_space<vmem>>, vector<1x1x32xf32>
    %170 = vector.shape_cast %169 : vector<1x1x32xf32> to vector<1x32xf32>
    %cst_62 = arith.constant dense<0.000000e+00> : vector<16xf32>
    %171 = vector.multi_reduction <add>, %166, %cst_62 [1] : vector<16x32xf32> to vector<16xf32>
    %172 = vector.shape_cast %171 : vector<16xf32> to vector<16x1xf32>
    %cst_63 = arith.constant 3.200000e+01 : f32
    %173 = vector.broadcast %cst_63 : f32 to vector<16x1xf32>
    %174 = arith.divf %172, %173 : vector<16x1xf32>
    %175 = vector.broadcast %174 : vector<16x1xf32> to vector<16x32xf32>
    %176 = arith.subf %166, %175 : vector<16x32xf32>
    %177 = arith.mulf %176, %176 : vector<16x32xf32>
    %cst_64 = arith.constant dense<0.000000e+00> : vector<16xf32>
    %178 = vector.multi_reduction <add>, %177, %cst_64 [1] : vector<16x32xf32> to vector<16xf32>
    %179 = vector.shape_cast %178 : vector<16xf32> to vector<16x1xf32>
    %cst_65 = arith.constant 3.200000e+01 : f32
    %180 = vector.broadcast %cst_65 : f32 to vector<16x1xf32>
    %181 = arith.divf %179, %180 : vector<16x1xf32>
    %cst_66 = arith.constant 9.99999974E-6 : f32
    %182 = vector.broadcast %cst_66 : f32 to vector<16x1xf32>
    %183 = arith.addf %181, %182 : vector<16x1xf32>
    %184 = math.rsqrt %183 : vector<16x1xf32>
    %185 = vector.broadcast %184 : vector<16x1xf32> to vector<16x32xf32>
    %186 = arith.mulf %176, %185 : vector<16x32xf32>
    %187 = vector.broadcast %168 : vector<1x32xf32> to vector<16x32xf32>
    %188 = arith.mulf %186, %187 : vector<16x32xf32>
    %189 = vector.broadcast %170 : vector<1x32xf32> to vector<16x32xf32>
    %190 = arith.addf %188, %189 : vector<16x32xf32>
    %191 = arith.truncf %190 : vector<16x32xf32> to vector<16x32xbf16>
    %c0_67 = arith.constant 0 : index
    %c0_68 = arith.constant 0 : index
    %c0_69 = arith.constant 0 : index
    %192 = vector.load %arg11[%c0_67, %c0_68, %c0_69] : memref<2x32x128xf32, #tpu.memory_space<vmem>>, vector<1x32x128xf32>
    %193 = vector.shape_cast %192 : vector<1x32x128xf32> to vector<32x128xf32>
    %194 = arith.truncf %193 : vector<32x128xf32> to vector<32x128xbf16>
    %cst_70 = arith.constant dense<0.000000e+00> : vector<16x128xf32>
    %195 = tpu.matmul %191, %194, %cst_70 {dimension_numbers = #tpu.dot_dimension_numbers<[1], [0], [0], [1], [0, 0, 1, 1], [], []>} : vector<16x32xbf16>, vector<32x128xbf16>, vector<16x128xf32> -> vector<16x128xf32>
    %c0_71 = arith.constant 0 : index
    %c0_72 = arith.constant 0 : index
    %c0_73 = arith.constant 0 : index
    %196 = vector.load %arg12[%c0_71, %c0_72, %c0_73] : memref<2x1x128xf32, #tpu.memory_space<vmem>>, vector<1x1x128xf32>
    %197 = vector.shape_cast %196 : vector<1x1x128xf32> to vector<1x128xf32>
    %198 = vector.broadcast %197 : vector<1x128xf32> to vector<16x128xf32>
    %199 = arith.addf %195, %198 : vector<16x128xf32>
    %cst_74 = arith.constant 5.000000e-01 : f32
    %200 = vector.broadcast %cst_74 : f32 to vector<16x128xf32>
    %201 = arith.mulf %200, %199 : vector<16x128xf32>
    %cst_75 = arith.constant 4.471500e-02 : f32
    %202 = vector.broadcast %cst_75 : f32 to vector<16x128xf32>
    %203 = arith.mulf %202, %199 : vector<16x128xf32>
    %204 = arith.mulf %203, %199 : vector<16x128xf32>
    %205 = arith.mulf %204, %199 : vector<16x128xf32>
    %206 = arith.addf %199, %205 : vector<16x128xf32>
    %cst_76 = arith.constant 0.797884583 : f32
    %207 = vector.broadcast %cst_76 : f32 to vector<16x128xf32>
    %208 = arith.mulf %207, %206 : vector<16x128xf32>
    %209 = math.tanh %208 : vector<16x128xf32>
    %cst_77 = arith.constant 1.000000e+00 : f32
    %210 = vector.broadcast %cst_77 : f32 to vector<16x128xf32>
    %211 = arith.addf %210, %209 : vector<16x128xf32>
    %212 = arith.mulf %201, %211 : vector<16x128xf32>
    %213 = arith.truncf %212 : vector<16x128xf32> to vector<16x128xbf16>
    %c0_78 = arith.constant 0 : index
    %c0_79 = arith.constant 0 : index
    %c0_80 = arith.constant 0 : index
    %214 = vector.load %arg13[%c0_78, %c0_79, %c0_80] : memref<2x128x32xf32, #tpu.memory_space<vmem>>, vector<1x128x32xf32>
    %215 = vector.shape_cast %214 : vector<1x128x32xf32> to vector<128x32xf32>
    %216 = arith.truncf %215 : vector<128x32xf32> to vector<128x32xbf16>
    %cst_81 = arith.constant dense<0.000000e+00> : vector<16x32xf32>
    %217 = tpu.matmul %213, %216, %cst_81 {dimension_numbers = #tpu.dot_dimension_numbers<[1], [0], [0], [1], [0, 0, 1, 1], [], []>} : vector<16x128xbf16>, vector<128x32xbf16>, vector<16x32xf32> -> vector<16x32xf32>
    %c0_82 = arith.constant 0 : index
    %c0_83 = arith.constant 0 : index
    %c0_84 = arith.constant 0 : index
    %218 = vector.load %arg14[%c0_82, %c0_83, %c0_84] : memref<2x1x32xf32, #tpu.memory_space<vmem>>, vector<1x1x32xf32>
    %219 = vector.shape_cast %218 : vector<1x1x32xf32> to vector<1x32xf32>
    %220 = vector.broadcast %219 : vector<1x32xf32> to vector<16x32xf32>
    %221 = arith.addf %217, %220 : vector<16x32xf32>
    %222 = arith.addf %166, %221 : vector<16x32xf32>
    %c1 = arith.constant 1 : index
    %c0_85 = arith.constant 0 : index
    %c0_86 = arith.constant 0 : index
    %223 = vector.load %arg3[%c1, %c0_85, %c0_86] : memref<2x1x32xf32, #tpu.memory_space<vmem>>, vector<1x1x32xf32>
    %224 = vector.shape_cast %223 : vector<1x1x32xf32> to vector<1x32xf32>
    %c1_87 = arith.constant 1 : index
    %c0_88 = arith.constant 0 : index
    %c0_89 = arith.constant 0 : index
    %225 = vector.load %arg4[%c1_87, %c0_88, %c0_89] : memref<2x1x32xf32, #tpu.memory_space<vmem>>, vector<1x1x32xf32>
    %226 = vector.shape_cast %225 : vector<1x1x32xf32> to vector<1x32xf32>
    %cst_90 = arith.constant dense<0.000000e+00> : vector<16xf32>
    %227 = vector.multi_reduction <add>, %222, %cst_90 [1] : vector<16x32xf32> to vector<16xf32>
    %228 = vector.shape_cast %227 : vector<16xf32> to vector<16x1xf32>
    %cst_91 = arith.constant 3.200000e+01 : f32
    %229 = vector.broadcast %cst_91 : f32 to vector<16x1xf32>
    %230 = arith.divf %228, %229 : vector<16x1xf32>
    %231 = vector.broadcast %230 : vector<16x1xf32> to vector<16x32xf32>
    %232 = arith.subf %222, %231 : vector<16x32xf32>
    %233 = arith.mulf %232, %232 : vector<16x32xf32>
    %cst_92 = arith.constant dense<0.000000e+00> : vector<16xf32>
    %234 = vector.multi_reduction <add>, %233, %cst_92 [1] : vector<16x32xf32> to vector<16xf32>
    %235 = vector.shape_cast %234 : vector<16xf32> to vector<16x1xf32>
    %cst_93 = arith.constant 3.200000e+01 : f32
    %236 = vector.broadcast %cst_93 : f32 to vector<16x1xf32>
    %237 = arith.divf %235, %236 : vector<16x1xf32>
    %cst_94 = arith.constant 9.99999974E-6 : f32
    %238 = vector.broadcast %cst_94 : f32 to vector<16x1xf32>
    %239 = arith.addf %237, %238 : vector<16x1xf32>
    %240 = math.rsqrt %239 : vector<16x1xf32>
    %241 = vector.broadcast %240 : vector<16x1xf32> to vector<16x32xf32>
    %242 = arith.mulf %232, %241 : vector<16x32xf32>
    %243 = vector.broadcast %224 : vector<1x32xf32> to vector<16x32xf32>
    %244 = arith.mulf %242, %243 : vector<16x32xf32>
    %245 = vector.broadcast %226 : vector<1x32xf32> to vector<16x32xf32>
    %246 = arith.addf %244, %245 : vector<16x32xf32>
    %247 = arith.truncf %246 : vector<16x32xf32> to vector<16x32xbf16>
    %c1_95 = arith.constant 1 : index
    %c0_96 = arith.constant 0 : index
    %c0_97 = arith.constant 0 : index
    %248 = vector.load %arg5[%c1_95, %c0_96, %c0_97] : memref<2x32x96xf32, #tpu.memory_space<vmem>>, vector<1x32x96xf32>
    %249 = vector.shape_cast %248 : vector<1x32x96xf32> to vector<32x96xf32>
    %250 = arith.truncf %249 : vector<32x96xf32> to vector<32x96xbf16>
    %cst_98 = arith.constant dense<0.000000e+00> : vector<16x96xf32>
    %251 = tpu.matmul %247, %250, %cst_98 {dimension_numbers = #tpu.dot_dimension_numbers<[1], [0], [0], [1], [0, 0, 1, 1], [], []>} : vector<16x32xbf16>, vector<32x96xbf16>, vector<16x96xf32> -> vector<16x96xf32>
    %c1_99 = arith.constant 1 : index
    %c0_100 = arith.constant 0 : index
    %c0_101 = arith.constant 0 : index
    %252 = vector.load %arg6[%c1_99, %c0_100, %c0_101] : memref<2x1x96xf32, #tpu.memory_space<vmem>>, vector<1x1x96xf32>
    %253 = vector.shape_cast %252 : vector<1x1x96xf32> to vector<1x96xf32>
    %254 = vector.broadcast %253 : vector<1x96xf32> to vector<16x96xf32>
    %255 = arith.addf %251, %254 : vector<16x96xf32>
    %c1_102 = arith.constant 1 : index
    %c0_103 = arith.constant 0 : index
    %c0_104 = arith.constant 0 : index
    %256 = vector.load %arg7[%c1_102, %c0_103, %c0_104] : memref<2x32x32xf32, #tpu.memory_space<vmem>>, vector<1x32x32xf32>
    %257 = vector.shape_cast %256 : vector<1x32x32xf32> to vector<32x32xf32>
    %cst_105 = arith.constant 0.000000e+00 : f32
    %258 = vector.broadcast %cst_105 : f32 to vector<16x32xf32>
    %259 = vector.extract_strided_slice %255 {offsets = [0, 0], sizes = [16, 8], strides = [1, 1]} : vector<16x96xf32> to vector<16x8xf32>
    %cst_106 = arith.constant 0.353553385 : f32
    %260 = vector.broadcast %cst_106 : f32 to vector<16x8xf32>
    %261 = arith.mulf %259, %260 : vector<16x8xf32>
    %262 = vector.extract_strided_slice %255 {offsets = [0, 32], sizes = [16, 8], strides = [1, 1]} : vector<16x96xf32> to vector<16x8xf32>
    %263 = vector.extract_strided_slice %255 {offsets = [0, 64], sizes = [16, 8], strides = [1, 1]} : vector<16x96xf32> to vector<16x8xf32>
    %264 = arith.truncf %261 : vector<16x8xf32> to vector<16x8xbf16>
    %265 = arith.truncf %262 : vector<16x8xf32> to vector<16x8xbf16>
    %cst_107 = arith.constant dense<0.000000e+00> : vector<16x16xf32>
    %266 = tpu.matmul %264, %265, %cst_107 {dimension_numbers = #tpu.dot_dimension_numbers<[1], [1], [0], [0], [0, 0, 1, 0], [], []>} : vector<16x8xbf16>, vector<16x8xbf16>, vector<16x16xf32> -> vector<16x16xf32>
    %267 = arith.addf %266, %21 : vector<16x16xf32>
    %cst_108 = arith.constant dense<0xFF800000> : vector<16xf32>
    %268 = vector.multi_reduction <maximumf>, %267, %cst_108 [1] : vector<16x16xf32> to vector<16xf32>
    %269 = vector.shape_cast %268 : vector<16xf32> to vector<16x1xf32>
    %270 = vector.broadcast %269 : vector<16x1xf32> to vector<16x16xf32>
    %271 = arith.subf %267, %270 : vector<16x16xf32>
    %272 = math.exp %271 : vector<16x16xf32>
    %cst_109 = arith.constant dense<0.000000e+00> : vector<16xf32>
    %273 = vector.multi_reduction <add>, %272, %cst_109 [1] : vector<16x16xf32> to vector<16xf32>
    %274 = vector.shape_cast %273 : vector<16xf32> to vector<16x1xf32>
    %275 = vector.broadcast %274 : vector<16x1xf32> to vector<16x16xf32>
    %276 = arith.divf %272, %275 : vector<16x16xf32>
    %277 = arith.truncf %276 : vector<16x16xf32> to vector<16x16xbf16>
    %278 = arith.truncf %263 : vector<16x8xf32> to vector<16x8xbf16>
    %cst_110 = arith.constant dense<0.000000e+00> : vector<16x8xf32>
    %279 = tpu.matmul %277, %278, %cst_110 {dimension_numbers = #tpu.dot_dimension_numbers<[1], [0], [0], [1], [0, 0, 1, 1], [], []>} : vector<16x16xbf16>, vector<16x8xbf16>, vector<16x8xf32> -> vector<16x8xf32>
    %280 = arith.truncf %279 : vector<16x8xf32> to vector<16x8xbf16>
    %281 = vector.extract_strided_slice %257 {offsets = [0, 0], sizes = [8, 32], strides = [1, 1]} : vector<32x32xf32> to vector<8x32xf32>
    %282 = arith.truncf %281 : vector<8x32xf32> to vector<8x32xbf16>
    %cst_111 = arith.constant dense<0.000000e+00> : vector<16x32xf32>
    %283 = tpu.matmul %280, %282, %cst_111 {dimension_numbers = #tpu.dot_dimension_numbers<[1], [0], [0], [1], [0, 0, 1, 1], [], []>} : vector<16x8xbf16>, vector<8x32xbf16>, vector<16x32xf32> -> vector<16x32xf32>
    %284 = arith.addf %258, %283 : vector<16x32xf32>
    %285 = vector.extract_strided_slice %255 {offsets = [0, 8], sizes = [16, 8], strides = [1, 1]} : vector<16x96xf32> to vector<16x8xf32>
    %cst_112 = arith.constant 0.353553385 : f32
    %286 = vector.broadcast %cst_112 : f32 to vector<16x8xf32>
    %287 = arith.mulf %285, %286 : vector<16x8xf32>
    %288 = vector.extract_strided_slice %255 {offsets = [0, 40], sizes = [16, 8], strides = [1, 1]} : vector<16x96xf32> to vector<16x8xf32>
    %289 = vector.extract_strided_slice %255 {offsets = [0, 72], sizes = [16, 8], strides = [1, 1]} : vector<16x96xf32> to vector<16x8xf32>
    %290 = arith.truncf %287 : vector<16x8xf32> to vector<16x8xbf16>
    %291 = arith.truncf %288 : vector<16x8xf32> to vector<16x8xbf16>
    %cst_113 = arith.constant dense<0.000000e+00> : vector<16x16xf32>
    %292 = tpu.matmul %290, %291, %cst_113 {dimension_numbers = #tpu.dot_dimension_numbers<[1], [1], [0], [0], [0, 0, 1, 0], [], []>} : vector<16x8xbf16>, vector<16x8xbf16>, vector<16x16xf32> -> vector<16x16xf32>
    %293 = arith.addf %292, %21 : vector<16x16xf32>
    %cst_114 = arith.constant dense<0xFF800000> : vector<16xf32>
    %294 = vector.multi_reduction <maximumf>, %293, %cst_114 [1] : vector<16x16xf32> to vector<16xf32>
    %295 = vector.shape_cast %294 : vector<16xf32> to vector<16x1xf32>
    %296 = vector.broadcast %295 : vector<16x1xf32> to vector<16x16xf32>
    %297 = arith.subf %293, %296 : vector<16x16xf32>
    %298 = math.exp %297 : vector<16x16xf32>
    %cst_115 = arith.constant dense<0.000000e+00> : vector<16xf32>
    %299 = vector.multi_reduction <add>, %298, %cst_115 [1] : vector<16x16xf32> to vector<16xf32>
    %300 = vector.shape_cast %299 : vector<16xf32> to vector<16x1xf32>
    %301 = vector.broadcast %300 : vector<16x1xf32> to vector<16x16xf32>
    %302 = arith.divf %298, %301 : vector<16x16xf32>
    %303 = arith.truncf %302 : vector<16x16xf32> to vector<16x16xbf16>
    %304 = arith.truncf %289 : vector<16x8xf32> to vector<16x8xbf16>
    %cst_116 = arith.constant dense<0.000000e+00> : vector<16x8xf32>
    %305 = tpu.matmul %303, %304, %cst_116 {dimension_numbers = #tpu.dot_dimension_numbers<[1], [0], [0], [1], [0, 0, 1, 1], [], []>} : vector<16x16xbf16>, vector<16x8xbf16>, vector<16x8xf32> -> vector<16x8xf32>
    %306 = arith.truncf %305 : vector<16x8xf32> to vector<16x8xbf16>
    %307 = vector.extract_strided_slice %257 {offsets = [8, 0], sizes = [8, 32], strides = [1, 1]} : vector<32x32xf32> to vector<8x32xf32>
    %308 = arith.truncf %307 : vector<8x32xf32> to vector<8x32xbf16>
    %cst_117 = arith.constant dense<0.000000e+00> : vector<16x32xf32>
    %309 = tpu.matmul %306, %308, %cst_117 {dimension_numbers = #tpu.dot_dimension_numbers<[1], [0], [0], [1], [0, 0, 1, 1], [], []>} : vector<16x8xbf16>, vector<8x32xbf16>, vector<16x32xf32> -> vector<16x32xf32>
    %310 = arith.addf %284, %309 : vector<16x32xf32>
    %311 = vector.extract_strided_slice %255 {offsets = [0, 16], sizes = [16, 8], strides = [1, 1]} : vector<16x96xf32> to vector<16x8xf32>
    %cst_118 = arith.constant 0.353553385 : f32
    %312 = vector.broadcast %cst_118 : f32 to vector<16x8xf32>
    %313 = arith.mulf %311, %312 : vector<16x8xf32>
    %314 = vector.extract_strided_slice %255 {offsets = [0, 48], sizes = [16, 8], strides = [1, 1]} : vector<16x96xf32> to vector<16x8xf32>
    %315 = vector.extract_strided_slice %255 {offsets = [0, 80], sizes = [16, 8], strides = [1, 1]} : vector<16x96xf32> to vector<16x8xf32>
    %316 = arith.truncf %313 : vector<16x8xf32> to vector<16x8xbf16>
    %317 = arith.truncf %314 : vector<16x8xf32> to vector<16x8xbf16>
    %cst_119 = arith.constant dense<0.000000e+00> : vector<16x16xf32>
    %318 = tpu.matmul %316, %317, %cst_119 {dimension_numbers = #tpu.dot_dimension_numbers<[1], [1], [0], [0], [0, 0, 1, 0], [], []>} : vector<16x8xbf16>, vector<16x8xbf16>, vector<16x16xf32> -> vector<16x16xf32>
    %319 = arith.addf %318, %21 : vector<16x16xf32>
    %cst_120 = arith.constant dense<0xFF800000> : vector<16xf32>
    %320 = vector.multi_reduction <maximumf>, %319, %cst_120 [1] : vector<16x16xf32> to vector<16xf32>
    %321 = vector.shape_cast %320 : vector<16xf32> to vector<16x1xf32>
    %322 = vector.broadcast %321 : vector<16x1xf32> to vector<16x16xf32>
    %323 = arith.subf %319, %322 : vector<16x16xf32>
    %324 = math.exp %323 : vector<16x16xf32>
    %cst_121 = arith.constant dense<0.000000e+00> : vector<16xf32>
    %325 = vector.multi_reduction <add>, %324, %cst_121 [1] : vector<16x16xf32> to vector<16xf32>
    %326 = vector.shape_cast %325 : vector<16xf32> to vector<16x1xf32>
    %327 = vector.broadcast %326 : vector<16x1xf32> to vector<16x16xf32>
    %328 = arith.divf %324, %327 : vector<16x16xf32>
    %329 = arith.truncf %328 : vector<16x16xf32> to vector<16x16xbf16>
    %330 = arith.truncf %315 : vector<16x8xf32> to vector<16x8xbf16>
    %cst_122 = arith.constant dense<0.000000e+00> : vector<16x8xf32>
    %331 = tpu.matmul %329, %330, %cst_122 {dimension_numbers = #tpu.dot_dimension_numbers<[1], [0], [0], [1], [0, 0, 1, 1], [], []>} : vector<16x16xbf16>, vector<16x8xbf16>, vector<16x8xf32> -> vector<16x8xf32>
    %332 = arith.truncf %331 : vector<16x8xf32> to vector<16x8xbf16>
    %333 = vector.extract_strided_slice %257 {offsets = [16, 0], sizes = [8, 32], strides = [1, 1]} : vector<32x32xf32> to vector<8x32xf32>
    %334 = arith.truncf %333 : vector<8x32xf32> to vector<8x32xbf16>
    %cst_123 = arith.constant dense<0.000000e+00> : vector<16x32xf32>
    %335 = tpu.matmul %332, %334, %cst_123 {dimension_numbers = #tpu.dot_dimension_numbers<[1], [0], [0], [1], [0, 0, 1, 1], [], []>} : vector<16x8xbf16>, vector<8x32xbf16>, vector<16x32xf32> -> vector<16x32xf32>
    %336 = arith.addf %310, %335 : vector<16x32xf32>
    %337 = vector.extract_strided_slice %255 {offsets = [0, 24], sizes = [16, 8], strides = [1, 1]} : vector<16x96xf32> to vector<16x8xf32>
    %cst_124 = arith.constant 0.353553385 : f32
    %338 = vector.broadcast %cst_124 : f32 to vector<16x8xf32>
    %339 = arith.mulf %337, %338 : vector<16x8xf32>
    %340 = vector.extract_strided_slice %255 {offsets = [0, 56], sizes = [16, 8], strides = [1, 1]} : vector<16x96xf32> to vector<16x8xf32>
    %341 = vector.extract_strided_slice %255 {offsets = [0, 88], sizes = [16, 8], strides = [1, 1]} : vector<16x96xf32> to vector<16x8xf32>
    %342 = arith.truncf %339 : vector<16x8xf32> to vector<16x8xbf16>
    %343 = arith.truncf %340 : vector<16x8xf32> to vector<16x8xbf16>
    %cst_125 = arith.constant dense<0.000000e+00> : vector<16x16xf32>
    %344 = tpu.matmul %342, %343, %cst_125 {dimension_numbers = #tpu.dot_dimension_numbers<[1], [1], [0], [0], [0, 0, 1, 0], [], []>} : vector<16x8xbf16>, vector<16x8xbf16>, vector<16x16xf32> -> vector<16x16xf32>
    %345 = arith.addf %344, %21 : vector<16x16xf32>
    %cst_126 = arith.constant dense<0xFF800000> : vector<16xf32>
    %346 = vector.multi_reduction <maximumf>, %345, %cst_126 [1] : vector<16x16xf32> to vector<16xf32>
    %347 = vector.shape_cast %346 : vector<16xf32> to vector<16x1xf32>
    %348 = vector.broadcast %347 : vector<16x1xf32> to vector<16x16xf32>
    %349 = arith.subf %345, %348 : vector<16x16xf32>
    %350 = math.exp %349 : vector<16x16xf32>
    %cst_127 = arith.constant dense<0.000000e+00> : vector<16xf32>
    %351 = vector.multi_reduction <add>, %350, %cst_127 [1] : vector<16x16xf32> to vector<16xf32>
    %352 = vector.shape_cast %351 : vector<16xf32> to vector<16x1xf32>
    %353 = vector.broadcast %352 : vector<16x1xf32> to vector<16x16xf32>
    %354 = arith.divf %350, %353 : vector<16x16xf32>
    %355 = arith.truncf %354 : vector<16x16xf32> to vector<16x16xbf16>
    %356 = arith.truncf %341 : vector<16x8xf32> to vector<16x8xbf16>
    %cst_128 = arith.constant dense<0.000000e+00> : vector<16x8xf32>
    %357 = tpu.matmul %355, %356, %cst_128 {dimension_numbers = #tpu.dot_dimension_numbers<[1], [0], [0], [1], [0, 0, 1, 1], [], []>} : vector<16x16xbf16>, vector<16x8xbf16>, vector<16x8xf32> -> vector<16x8xf32>
    %358 = arith.truncf %357 : vector<16x8xf32> to vector<16x8xbf16>
    %359 = vector.extract_strided_slice %257 {offsets = [24, 0], sizes = [8, 32], strides = [1, 1]} : vector<32x32xf32> to vector<8x32xf32>
    %360 = arith.truncf %359 : vector<8x32xf32> to vector<8x32xbf16>
    %cst_129 = arith.constant dense<0.000000e+00> : vector<16x32xf32>
    %361 = tpu.matmul %358, %360, %cst_129 {dimension_numbers = #tpu.dot_dimension_numbers<[1], [0], [0], [1], [0, 0, 1, 1], [], []>} : vector<16x8xbf16>, vector<8x32xbf16>, vector<16x32xf32> -> vector<16x32xf32>
    %362 = arith.addf %336, %361 : vector<16x32xf32>
    %363 = arith.addf %222, %362 : vector<16x32xf32>
    %c1_130 = arith.constant 1 : index
    %c0_131 = arith.constant 0 : index
    %c0_132 = arith.constant 0 : index
    %364 = vector.load %arg8[%c1_130, %c0_131, %c0_132] : memref<2x1x32xf32, #tpu.memory_space<vmem>>, vector<1x1x32xf32>
    %365 = vector.shape_cast %364 : vector<1x1x32xf32> to vector<1x32xf32>
    %366 = vector.broadcast %365 : vector<1x32xf32> to vector<16x32xf32>
    %367 = arith.addf %363, %366 : vector<16x32xf32>
    %c1_133 = arith.constant 1 : index
    %c0_134 = arith.constant 0 : index
    %c0_135 = arith.constant 0 : index
    %368 = vector.load %arg9[%c1_133, %c0_134, %c0_135] : memref<2x1x32xf32, #tpu.memory_space<vmem>>, vector<1x1x32xf32>
    %369 = vector.shape_cast %368 : vector<1x1x32xf32> to vector<1x32xf32>
    %c1_136 = arith.constant 1 : index
    %c0_137 = arith.constant 0 : index
    %c0_138 = arith.constant 0 : index
    %370 = vector.load %arg10[%c1_136, %c0_137, %c0_138] : memref<2x1x32xf32, #tpu.memory_space<vmem>>, vector<1x1x32xf32>
    %371 = vector.shape_cast %370 : vector<1x1x32xf32> to vector<1x32xf32>
    %cst_139 = arith.constant dense<0.000000e+00> : vector<16xf32>
    %372 = vector.multi_reduction <add>, %367, %cst_139 [1] : vector<16x32xf32> to vector<16xf32>
    %373 = vector.shape_cast %372 : vector<16xf32> to vector<16x1xf32>
    %cst_140 = arith.constant 3.200000e+01 : f32
    %374 = vector.broadcast %cst_140 : f32 to vector<16x1xf32>
    %375 = arith.divf %373, %374 : vector<16x1xf32>
    %376 = vector.broadcast %375 : vector<16x1xf32> to vector<16x32xf32>
    %377 = arith.subf %367, %376 : vector<16x32xf32>
    %378 = arith.mulf %377, %377 : vector<16x32xf32>
    %cst_141 = arith.constant dense<0.000000e+00> : vector<16xf32>
    %379 = vector.multi_reduction <add>, %378, %cst_141 [1] : vector<16x32xf32> to vector<16xf32>
    %380 = vector.shape_cast %379 : vector<16xf32> to vector<16x1xf32>
    %cst_142 = arith.constant 3.200000e+01 : f32
    %381 = vector.broadcast %cst_142 : f32 to vector<16x1xf32>
    %382 = arith.divf %380, %381 : vector<16x1xf32>
    %cst_143 = arith.constant 9.99999974E-6 : f32
    %383 = vector.broadcast %cst_143 : f32 to vector<16x1xf32>
    %384 = arith.addf %382, %383 : vector<16x1xf32>
    %385 = math.rsqrt %384 : vector<16x1xf32>
    %386 = vector.broadcast %385 : vector<16x1xf32> to vector<16x32xf32>
    %387 = arith.mulf %377, %386 : vector<16x32xf32>
    %388 = vector.broadcast %369 : vector<1x32xf32> to vector<16x32xf32>
    %389 = arith.mulf %387, %388 : vector<16x32xf32>
    %390 = vector.broadcast %371 : vector<1x32xf32> to vector<16x32xf32>
    %391 = arith.addf %389, %390 : vector<16x32xf32>
    %392 = arith.truncf %391 : vector<16x32xf32> to vector<16x32xbf16>
    %c1_144 = arith.constant 1 : index
    %c0_145 = arith.constant 0 : index
    %c0_146 = arith.constant 0 : index
    %393 = vector.load %arg11[%c1_144, %c0_145, %c0_146] : memref<2x32x128xf32, #tpu.memory_space<vmem>>, vector<1x32x128xf32>
    %394 = vector.shape_cast %393 : vector<1x32x128xf32> to vector<32x128xf32>
    %395 = arith.truncf %394 : vector<32x128xf32> to vector<32x128xbf16>
    %cst_147 = arith.constant dense<0.000000e+00> : vector<16x128xf32>
    %396 = tpu.matmul %392, %395, %cst_147 {dimension_numbers = #tpu.dot_dimension_numbers<[1], [0], [0], [1], [0, 0, 1, 1], [], []>} : vector<16x32xbf16>, vector<32x128xbf16>, vector<16x128xf32> -> vector<16x128xf32>
    %c1_148 = arith.constant 1 : index
    %c0_149 = arith.constant 0 : index
    %c0_150 = arith.constant 0 : index
    %397 = vector.load %arg12[%c1_148, %c0_149, %c0_150] : memref<2x1x128xf32, #tpu.memory_space<vmem>>, vector<1x1x128xf32>
    %398 = vector.shape_cast %397 : vector<1x1x128xf32> to vector<1x128xf32>
    %399 = vector.broadcast %398 : vector<1x128xf32> to vector<16x128xf32>
    %400 = arith.addf %396, %399 : vector<16x128xf32>
    %cst_151 = arith.constant 5.000000e-01 : f32
    %401 = vector.broadcast %cst_151 : f32 to vector<16x128xf32>
    %402 = arith.mulf %401, %400 : vector<16x128xf32>
    %cst_152 = arith.constant 4.471500e-02 : f32
    %403 = vector.broadcast %cst_152 : f32 to vector<16x128xf32>
    %404 = arith.mulf %403, %400 : vector<16x128xf32>
    %405 = arith.mulf %404, %400 : vector<16x128xf32>
    %406 = arith.mulf %405, %400 : vector<16x128xf32>
    %407 = arith.addf %400, %406 : vector<16x128xf32>
    %cst_153 = arith.constant 0.797884583 : f32
    %408 = vector.broadcast %cst_153 : f32 to vector<16x128xf32>
    %409 = arith.mulf %408, %407 : vector<16x128xf32>
    %410 = math.tanh %409 : vector<16x128xf32>
    %cst_154 = arith.constant 1.000000e+00 : f32
    %411 = vector.broadcast %cst_154 : f32 to vector<16x128xf32>
    %412 = arith.addf %411, %410 : vector<16x128xf32>
    %413 = arith.mulf %402, %412 : vector<16x128xf32>
    %414 = arith.truncf %413 : vector<16x128xf32> to vector<16x128xbf16>
    %c1_155 = arith.constant 1 : index
    %c0_156 = arith.constant 0 : index
    %c0_157 = arith.constant 0 : index
    %415 = vector.load %arg13[%c1_155, %c0_156, %c0_157] : memref<2x128x32xf32, #tpu.memory_space<vmem>>, vector<1x128x32xf32>
    %416 = vector.shape_cast %415 : vector<1x128x32xf32> to vector<128x32xf32>
    %417 = arith.truncf %416 : vector<128x32xf32> to vector<128x32xbf16>
    %cst_158 = arith.constant dense<0.000000e+00> : vector<16x32xf32>
    %418 = tpu.matmul %414, %417, %cst_158 {dimension_numbers = #tpu.dot_dimension_numbers<[1], [0], [0], [1], [0, 0, 1, 1], [], []>} : vector<16x128xbf16>, vector<128x32xbf16>, vector<16x32xf32> -> vector<16x32xf32>
    %c1_159 = arith.constant 1 : index
    %c0_160 = arith.constant 0 : index
    %c0_161 = arith.constant 0 : index
    %419 = vector.load %arg14[%c1_159, %c0_160, %c0_161] : memref<2x1x32xf32, #tpu.memory_space<vmem>>, vector<1x1x32xf32>
    %420 = vector.shape_cast %419 : vector<1x1x32xf32> to vector<1x32xf32>
    %421 = vector.broadcast %420 : vector<1x32xf32> to vector<16x32xf32>
    %422 = arith.addf %418, %421 : vector<16x32xf32>
    %423 = arith.addf %367, %422 : vector<16x32xf32>
    %c0_162 = arith.constant 0 : index
    %c0_163 = arith.constant 0 : index
    %424 = vector.load %arg15[%c0_162, %c0_163] : memref<1x32xf32, #tpu.memory_space<vmem>>, vector<1x32xf32>
    %c0_164 = arith.constant 0 : index
    %c0_165 = arith.constant 0 : index
    %425 = vector.load %arg16[%c0_164, %c0_165] : memref<1x32xf32, #tpu.memory_space<vmem>>, vector<1x32xf32>
    %cst_166 = arith.constant dense<0.000000e+00> : vector<16xf32>
    %426 = vector.multi_reduction <add>, %423, %cst_166 [1] : vector<16x32xf32> to vector<16xf32>
    %427 = vector.shape_cast %426 : vector<16xf32> to vector<16x1xf32>
    %cst_167 = arith.constant 3.200000e+01 : f32
    %428 = vector.broadcast %cst_167 : f32 to vector<16x1xf32>
    %429 = arith.divf %427, %428 : vector<16x1xf32>
    %430 = vector.broadcast %429 : vector<16x1xf32> to vector<16x32xf32>
    %431 = arith.subf %423, %430 : vector<16x32xf32>
    %432 = arith.mulf %431, %431 : vector<16x32xf32>
    %cst_168 = arith.constant dense<0.000000e+00> : vector<16xf32>
    %433 = vector.multi_reduction <add>, %432, %cst_168 [1] : vector<16x32xf32> to vector<16xf32>
    %434 = vector.shape_cast %433 : vector<16xf32> to vector<16x1xf32>
    %cst_169 = arith.constant 3.200000e+01 : f32
    %435 = vector.broadcast %cst_169 : f32 to vector<16x1xf32>
    %436 = arith.divf %434, %435 : vector<16x1xf32>
    %cst_170 = arith.constant 9.99999974E-6 : f32
    %437 = vector.broadcast %cst_170 : f32 to vector<16x1xf32>
    %438 = arith.addf %436, %437 : vector<16x1xf32>
    %439 = math.rsqrt %438 : vector<16x1xf32>
    %440 = vector.broadcast %439 : vector<16x1xf32> to vector<16x32xf32>
    %441 = arith.mulf %431, %440 : vector<16x32xf32>
    %442 = vector.broadcast %424 : vector<1x32xf32> to vector<16x32xf32>
    %443 = arith.mulf %441, %442 : vector<16x32xf32>
    %444 = vector.broadcast %425 : vector<1x32xf32> to vector<16x32xf32>
    %445 = arith.addf %443, %444 : vector<16x32xf32>
    %446 = vector.shape_cast %445 : vector<16x32xf32> to vector<2x8x32xf32>
    %c0_171 = arith.constant 0 : index
    %c0_172 = arith.constant 0 : index
    %c0_173 = arith.constant 0 : index
    %447 = vector.load %arg17[%c0_171, %c0_172, %c0_173] : memref<2x8x32xf32, #tpu.memory_space<vmem>>, vector<2x8x32xf32>
    tpu.vector_store %arg17[%c0_171, %c0_172, %c0_173], %446 {strides = array<i32>} : memref<2x8x32xf32, #tpu.memory_space<vmem>>, vector<2x8x32xf32>,
    return
  }
}

</mosaic_0001>

<bundles_post_ra>
// kernel: openclip_encode.1
= control target key start
LH: loop header
LB: loop body
LE: loop exit
PB: predicated region body
PF: predicated region fallthrough
CT: control target
= control target key end

     0   :  { %s3537_s0 = inlined_call_operand.vmem [shape: s32[16,1], index: 0, kind: input, shape index: {}]   ;;  %s3538_s1 = inlined_call_operand.vmem [shape: f32[64,32], index: 1, kind: input, shape index: {}]   ;;  %s3539_s2 = inlined_call_operand.vmem [shape: f32[16,32], index: 2, kind: input, shape index: {}]   ;;  %s3540_s3 = inlined_call_operand.vmem [shape: f32[2,1,32], index: 3, kind: input, shape index: {}]   ;;  %s3541_s4 = inlined_call_operand.vmem [shape: f32[2,1,32], index: 4, kind: input, shape index: {}]   ;;  %s3542_s5 = inlined_call_operand.vmem [shape: f32[2,32,96], index: 5, kind: input, shape index: {}]   ;;  %s3543_s6 = inlined_call_operand.vmem [shape: f32[2,1,96], index: 6, kind: input, shape index: {}]   ;;  %s3544_s7 = inlined_call_operand.vmem [shape: f32[2,32,32], index: 7, kind: input, shape index: {}]   ;;  %s3545_s8 = inlined_call_operand.vmem [shape: f32[2,1,32], index: 8, kind: input, shape index: {}]   ;;  %s3546_s9 = inlined_call_operand.vmem [shape: f32[2,1,32], index: 9, kind: input, shape index: {}]   ;;  %s3547_s10 = inlined_call_operand.vmem [shape: f32[2,1,32], index: 10, kind: input, shape index: {}]   ;;  %s3548_s11 = inlined_call_operand.vmem [shape: f32[2,32,128], index: 11, kind: input, shape index: {}]   ;;  %s3549_s12 = inlined_call_operand.vmem [shape: f32[2,1,128], index: 12, kind: input, shape index: {}]   ;;  %s3550_s13 = inlined_call_operand.vmem [shape: f32[2,128,32], index: 13, kind: input, shape index: {}]   ;;  %s3551_s14 = inlined_call_operand.vmem [shape: f32[2,1,32], index: 14, kind: input, shape index: {}]   ;;  %s3552_s15 = inlined_call_operand.vmem [shape: f32[1,32], index: 15, kind: input, shape index: {}]   ;;  %s3553_s16 = inlined_call_operand.vmem [shape: f32[1,32], index: 16, kind: input, shape index: {}]   ;;  %s3554_s17 = inlined_call_operand.hbm [shape: f32[2,8,32], index: 17, kind: output, shape index: {}]  }
   0x1   :  { %3562 = sst [smem:[#allocation5_spill]] %s3537_s0 }
   0x2   :  { %3563 = sst [smem:[#allocation6_spill]] %s3538_s1 }
   0x3   :  { %3564 = sst [smem:[#allocation7_spill]] %s3549_s12 }
   0x4   :  { %s3565_s26 = sld [smem:[#allocation5_spill]]  ;;  %s3566_s12 = sld [smem:[#allocation6_spill]]  ;;  %v2816_v2 = vmov 0  }
   0x5   :  { %2699 = vset.pattern.permute.xlu0 %v2816_v2 }
   0xa   :  { %v58_v0 = vld [vmem:[%s3565_s26] sm:$0xff]  ;;  %v75_v3 = vld [vmem:[%s3566_s12 + $0x8] sm:$0xff]  ;;  %v76_v4 = vld [vmem:[%s3566_s12 + $0x10] sm:$0xff] }
   0xb   :  { %v74_v1 = vld [vmem:[%s3566_s12] sm:$0xff]  ;;  %v77_v5 = vld [vmem:[%s3566_s12 + $0x18] sm:$0xff]  ;;  %63 = vperm.xlu0 %2699, %v58_v0   ;;  %v59_v6 = vld [vmem:[%s3565_s26 + $0x8] sm:$0xff] }
   0xc   :  { %v2665_v7 = vpack.c.bf16 %v75_v3, %v74_v1  ;;  %v2669_v8 = vpack.c.bf16 %v77_v5, %v76_v4  ;;  %v78_v9 = vld [vmem:[%s3566_s12 + $0x20] sm:$0xff]  ;;  %v79_v10 = vld [vmem:[%s3566_s12 + $0x28] sm:$0xff] }
   0xd   :  { %22 = vsyncpa [#allocation3], 0  ;;  %v2817_v11 = vmov 0.0   ;;  %v2673_v12 = vpack.c.bf16 %v79_v10, %v78_v9  ;;  %v80_v13 = vld [vmem:[%s3566_s12 + $0x30] sm:$0xff]  ;;  %v81_v14 = vld [vmem:[%s3566_s12 + $0x38] sm:$0xff]  ;;  %v60_v16 = vlaneseq  ;;  %vm84_vm0 = vcmask 523264  }
   0xe   :  { %2666 = vmatprep.subr.bf16.mxu1 %v2665_v7  ;;  %2463 = vmatprep.subr.bf16.mxu0 %v2817_v11  ;;  %v2677_v15 = vpack.c.bf16 %v81_v14, %v80_v13  ;;  %v82_v22 = vld [vmem:[%s3539_s2] sm:$0xff]  ;;  %v83_v24 = vld [vmem:[%s3539_s2 + $0x8] sm:$0xff]  ;;  %vm179_vm3 = vcmask 261120   ;;  %v226_v43 = vld [vmem:[%s3542_s5 + $0x10] sm:$0xff]  ;;  %vm2818_vm4 = vmmov 0   ;;  %s2819_s0 = smov 96  }
   0xf   :  { %2668 = vmatpush3.bf16.msra.mxu1 %v2665_v7  ;;  %66 = vperm.xlu0 %2699, %v59_v6   ;;  %v2957_v17 = vand.u32 127, %v60_v16  ;;  %v224_v40 = vld [vmem:[%s3542_s5] sm:$0xff]  ;;  %v225_v41 = vld [vmem:[%s3542_s5 + $0x8] sm:$0xff]  ;;  %v227_v44 = vld [vmem:[%s3542_s5 + $0x18] sm:$0xff]  ;;  %s2820_s30 = smov 88   ;;  %s2821_s18 = smov 120  }
  0x10   :  { %2670 = vmatprep.subr.bf16.mxu1 %v2669_v8  ;;  %v228_v42 = vpack.c.bf16 %v225_v41, %v224_v40  ;;  %v229_v45 = vpack.c.bf16 %v227_v44, %v226_v43  ;;  %2465 = vmatprep.mubr.msk.bf16.mxu0 %vm2818_vm4, %v2817_v11  ;;  %v2260_v54 = vld [vmem:[%s3540_s3] ss:$0 sm:$0xff]  ;;  %vm292_vm5 = vcmask 64512   ;;  %vm340_vm10 = vcmask 130048   ;;  %s2823_s2 = smov 56   ;;  %s2824_s19 = smov 112  }
  0x11   :  { %v2261_v58 = vld [vmem:[%s3541_s4] ss:$0 sm:$0xff]  ;;  %vm170_vm6 = vcmp.ge.s32.totalorder %v2957_v17, 8  ;;  %s2825_s1 = smov 64   ;;  %s2826_s20 = smov 80   ;;  %vm540_vm11 = vcmask 1043456  }
  0x12   :  { %v2262_v63 = vld [vmem:[%s3543_s6] ss:$0 sm:$0xff]  ;;  %s3560_s25 = smov 48   ;;  %s3559_s26 = smov 104  }
  0x13   :  { %2672 = vmatpush3.bf16.msra.mxu1 %v2669_v8  ;;  %s3561_s27 = smov 72   ;;  %s3558_s12 = smov 40  }
  0x14   :  { %2674 = vmatprep.subr.bf16.mxu1 %v2673_v12  ;;  %s2831_s29 = smov [#allocation2]  }
  0x17   :  { %2676 = vmatpush3.bf16.msra.mxu1 %v2673_v12 }
  0x18   :  { %2678 = vmatprep.subr.bf16.mxu1 %v2677_v15 }
  0x1b   :  { %2680 = vmatpush3.bf16.msra.mxu1 %v2677_v15 }
  0x1c   :  { %2449 = vmatprep.subr.bf16.mxu1 %v2817_v11 }
  0x8a   :  { %v64_v18 = vpop.permute.xlu0 %63 }
  0x8b   :  { %vm68_vm1 = vcmp.eq.s32.totalorder %v64_v18, %v2957_v17  ;;  %v167_v18 = vshrl.u32 %v60_v16, 7 }
  0x8c   :  { %v2256_v19 = vsel %vm68_vm1, 1.0, %v2817_v11 }
  0x8d   :  { %2446 = vmatprep.mubr.msk.f32.mxu1 %vm84_vm0, %v2256_v19  ;;  %v168_v19 = vadd.s32 8, %v167_v18  ;;  %vm171_vm8 = vcmp.le.s32.totalorder %v2957_v17, %v167_v18  ;;  %v282_v18 = vld [vmem:[%s3544_s7 + $0x8] sm:$0xff] }
  0x8e   :  { %v67_v20 = vpop.permute.xlu0 %66 }
  0x8f   :  { %vm69_vm2 = vcmp.eq.s32.totalorder %v67_v20, %v2957_v17  ;;  %vm172_vm7 = vcmp.le.s32.totalorder %v2957_v17, %v168_v19  ;;  %v2822_v20 = vmov -1e+30  }
  0x90   :  { %v2257_v21 = vsel %vm69_vm2, 1.0, %v2817_v11  ;;  %vm174_vm9 = vmand %vm170_vm6, %vm172_vm7 }
  0x91   :  { %2447 = vmatmul.mubr.msk.f32.vlgmr.msra.gmra.mrb[0].mxu1 %vm84_vm0, %v2257_v21  ;;  %v3036_v21 = vsel %vm171_vm8, 0.0, %v2822_v20 }
  0x92   :  { %2450 = vmatpush3.bf16.msra.mxu1 %v228_v42  ;;  %2453 = vmatprep.mubr.msk.bf16.mxu1 %vm2818_vm4, %v2817_v11 }
  0x93   :  { %2451 = vmatprep.subr.bf16.mxu1 %v2817_v11 }
  0x96   :  { %2452 = vmatpush3.bf16.msra.mxu1 %v229_v45 }
  0x97   :  { %2457 = vmatprep.subr.bf16.mxu1 %v2817_v11 }
 0x164   :  { %v2448_v23 = vpop.f32.mrb[0].mxu1 }
 0x165   :  { %v157_v25 = vpop.f32.mrb[1].mxu1  ;;  %v2971_v27 = vadd.f32 %v2448_v23, %v83_v24  ;;  %v3038_v23 = vsel %vm174_vm9, 0.0, %v2822_v20  ;;  %v536_v20 = vpack.c.bf16 %v282_v18, %v282_v18 }
 0x166   :  { %v2969_v26 = vadd.f32 %v157_v25, %v82_v22 }
 0x167   :  { %v183_v29 = vsel %vm179_vm3, %v2971_v27, 0.0 }
 0x168   :  { %v180_v28 = vsel %vm179_vm3, %v2969_v26, 0.0 }
 0x169   :  { %181 = vadd.xlane.f32.xlu1 %v180_v28 }
 0x16d   :  { %184 = vadd.xlane.f32.xlu1 %v183_v29 }
 0x1f6   :  { %v182_v30 = vpop.xlane.xlu1 %181 }
 0x1f7   :  { %v187_v31 = vmul.f32 0.03125, %v182_v30 }
 0x1f9   :  { %v189_v32 = vsub.f32 %v2969_v26, %v187_v31 }
 0x1fa   :  { %v185_v33 = vpop.xlane.xlu1 %184 }
 0x1fb   :  { %v188_v34 = vmul.f32 0.03125, %v185_v33  ;;  %v191_v35 = vmul.f32 %v189_v32, %v189_v32 }
 0x1fd   :  { %v190_v36 = vsub.f32 %v2971_v27, %v188_v34  ;;  %v193_v37 = vsel %vm179_vm3, %v191_v35, 0.0 }
 0x1fe   :  { %194 = vadd.xlane.f32.xlu0 %v193_v37 }
 0x1ff   :  { %v192_v38 = vmul.f32 %v190_v36, %v190_v36 }
 0x201   :  { %v196_v39 = vsel %vm179_vm3, %v192_v38, 0.0 }
 0x202   :  { %197 = vadd.xlane.f32.xlu1 %v196_v39 }
 0x28b   :  { %v195_v46 = vpop.xlane.xlu0 %194 }
 0x28c   :  { %v199_v47 = vmul.f32 0.03125, %v195_v46 }
 0x28e   :  { %v201_v48 = vadd.f32 1e-05, %v199_v47 }
 0x28f   :  { %v198_v49 = vpop.xlane.xlu1 %197 }
 0x290   :  { %2700 = vrsqrt.f32 %v201_v48  ;;  %v200_v50 = vmul.f32 0.03125, %v198_v49 }
 0x292   :  { %v202_v51 = vadd.f32 1e-05, %v200_v50 }
 0x294   :  { %2702 = vrsqrt.f32 %v202_v51 }
 0x29a   :  { %v2701_v52 = vpop.eup %2700 }
 0x29b   :  { %v205_v53 = vmul.f32 %v2701_v52, %v189_v32 }
 0x29d   :  { %v213_v56 = vmul.f32 %v2260_v54, %v205_v53 }
 0x29e   :  { %v2703_v55 = vpop.eup %2702 }
 0x29f   :  { %v206_v57 = vmul.f32 %v2703_v55, %v190_v36  ;;  %v221_v60 = vadd.f32 %v2261_v58, %v213_v56 }
 0x2a1   :  { %v214_v59 = vmul.f32 %v2260_v54, %v206_v57 }
 0x2a3   :  { %v222_v61 = vadd.f32 %v2261_v58, %v214_v59 }
 0x2a5   :  { %v223_v62 = vpack.c.bf16 %v222_v61, %v221_v60 }
 0x2a7   :  { %2454 = vmatmul.mubr.msk.bf16.vlgmr.msra.gmra.mrb[4].mxu1 %vm179_vm3, %v223_v62 }
 0x2a8   :  { %2459 = vmatprep.mubr.msk.bf16.mxu1 %vm2818_vm4, %v2817_v11 }
 0x37a   :  { %v274_v0 = vpop.f32.mrb[4].mxu1 }
 0x37b   :  { %v275_v1 = vadd.f32 %v2262_v63, %v274_v0  ;;  %v2455_v2 = vpop.f32.mrb[5].mxu1 }
 0x37c   :  { %v277_v3 = vpop.f32.mrb[6].mxu1 }
 0x37d   :  { %v278_v4 = vadd.f32 %v2262_v63, %v277_v3  ;;  %v2456_v5 = vpop.f32.mrb[7].mxu1  ;;  %v285_v6 = vmul.f32 0.35355338, %v275_v1 }
 0x37f   :  { %v286_v7 = vmul.f32 0.35355338, %v278_v4  ;;  %v3011_v8 = vpack.c.bf16 %v278_v4, %v275_v1 }
 0x381   :  { %v3013_v9 = vpack.c.bf16 %v286_v7, %v285_v6  ;;  %290 = vrot.lane.b32.xlu1 %v3011_v8, %s2819_s0 }
 0x385   :  { %416 = vrot.lane.b32.xlu1 %v3011_v8, %s2820_s30 }
 0x389   :  { %414 = vrot.lane.b32.xlu1 %v3013_v9, %s2821_s18 }
 0x3f3   :  { %v291_v10 = vpop.permute.xlu1 %290 }
 0x3f4   :  { %v297_v12 = vsel %vm292_vm5, %v291_v10, 0 }
 0x3f5   :  { %2458 = vmatpush3.bf16.xpose.msra.mxu1 %v297_v12 }
 0x3f6   :  { %2469 = vmatprep.subr.bf16.mxu1 %v2817_v11 }
 0x3f7   :  { %v417_v13 = vpop.permute.xlu1 %416 }
 0x3f8   :  { %v422_v14 = vsel %vm292_vm5, %v417_v13, 0 }
 0x3fb   :  { %v415_v15 = vpop.permute.xlu1 %414 }
 0x3fc   :  { %2460 = vmatmul.mubr.msk.bf16.vlgmr.msra.gmra.mrb[8].mxu1 %vm292_vm5, %v3013_v9 }
 0x3fd   :  { %2470 = vmatpush3.bf16.xpose.msra.mxu1 %v422_v14  ;;  %2471 = vmatprep.mubr.msk.bf16.mxu1 %vm2818_vm4, %v2817_v11  ;;  %v281_v14 = vld [vmem:[%s3544_s7] sm:$0xff] }
 0x3fe   :  { %2481 = vmatprep.subr.bf16.mxu1 %v2817_v11 }
 0x404   :  { %2472 = vmatmul.mubr.msk.bf16.vlgmr.msra.gmra.mrb[12].mxu1 %vm292_vm5, %v415_v15  ;;  %v412_v15 = vpack.c.bf16 %v281_v14, %v281_v14  ;;  %v283_v14 = vld [vmem:[%s3544_s7 + $0x10] sm:$0xff] }
 0x405   :  { %2483 = vmatprep.mubr.msk.bf16.mxu1 %vm2818_vm4, %v2817_v11 }
 0x406   :  { %v589_v19 = vsel %vm540_vm11, %v412_v15, 0  ;;  %v754_v15 = vpack.c.bf16 %v283_v14, %v283_v14 }
 0x408   :  { %v759_v18 = vsel %vm540_vm11, %v754_v15, 0 }
 0x4cf   :  { %v333_v22 = vpop.f32.mrb[8].mxu1 }
 0x4d0   :  { %v334_v24 = vadd.f32 %v333_v22, %v3036_v21  ;;  %v2461_v25 = vpop.f32.mrb[9].mxu1  ;;  %v542_v22 = vsel %vm540_vm11, %v536_v20, 0 }
 0x4d1   :  { %v336_v28 = vpop.f32.mrb[10].mxu1  ;;  %2482 = vmatpush3.bf16.msra.mxu1 %v542_v22 }
 0x4d2   :  { %v337_v16 = vadd.f32 %v336_v28, %v3038_v23  ;;  %v2462_v29 = vpop.f32.mrb[11].mxu1  ;;  %v341_v30 = vsel %vm340_vm10, %v334_v24, -inf  ;;  %2493 = vmatprep.subr.bf16.mxu1 %v2817_v11 }
 0x4d3   :  { %342 = vmax.xlane.f32.xlu1 %v341_v30 }
 0x4d4   :  { %v344_v17 = vsel %vm340_vm10, %v337_v16, -inf }
 0x4d5   :  { %345 = vmax.xlane.f32.xlu0 %v344_v17 }
 0x4d7   :  { %v458_v31 = vpop.f32.mrb[12].mxu1 }
 0x4d8   :  { %v459_v32 = vadd.f32 %v458_v31, %v3036_v21  ;;  %v2473_v33 = vpop.f32.mrb[13].mxu1 }
 0x4d9   :  { %v461_v34 = vpop.f32.mrb[14].mxu1 }
 0x4da   :  { %v462_v35 = vadd.f32 %v461_v34, %v3038_v23  ;;  %v2474_v36 = vpop.f32.mrb[15].mxu1  ;;  %v465_v37 = vsel %vm340_vm10, %v459_v32, -inf }
 0x4db   :  { %466 = vmax.xlane.f32.xlu0 %v465_v37 }
 0x4dc   :  { %v468_v38 = vsel %vm340_vm10, %v462_v35, -inf }
 0x4df   :  { %469 = vmax.xlane.f32.xlu0 %v468_v38 }
 0x4e4   :  { %488 = vrot.lane.b32.xlu1 %v3011_v8, %s2823_s2 }
 0x4e8   :  { %632 = vrot.lane.b32.xlu1 %v3013_v9, %s2824_s19 }
 0x560   :  { %v343_v39 = vpop.xlane.xlu1 %342 }
 0x561   :  { %v347_v40 = vsub.f32 %v334_v24, %v343_v39 }
 0x562   :  { %v346_v41 = vpop.xlane.xlu0 %345 }
 0x563   :  { %v349_v42 = vmul.f32 1.442695, %v347_v40  ;;  %v348_v43 = vsub.f32 %v337_v16, %v346_v41 }
 0x564   :  { %v489_v5 = vpop.permute.xlu1 %488 }
 0x565   :  { %2704 = vpow2.f32 %v349_v42  ;;  %v351_v44 = vmul.f32 1.442695, %v348_v43 }
 0x567   :  { %2706 = vpow2.f32 %v351_v44 }
 0x568   :  { %v467_v45 = vpop.xlane.xlu0 %466  ;;  %v633_v36 = vpop.permute.xlu1 %632 }
 0x569   :  { %v471_v46 = vsub.f32 %v459_v32, %v467_v45 }
 0x56b   :  { %v473_v47 = vmul.f32 1.442695, %v471_v46 }
 0x56c   :  { %v470_v48 = vpop.xlane.xlu0 %469 }
 0x56d   :  { %2708 = vpow2.f32 %v473_v47  ;;  %v472_v49 = vsub.f32 %v462_v35, %v470_v48 }
 0x56f   :  { %v2705_v50 = vpop.eup %2704  ;;  %v475_v51 = vmul.f32 1.442695, %v472_v49 }
 0x570   :  { %v353_v52 = vsel %vm340_vm10, %v2705_v50, 0.0 }
 0x571   :  { %v2707_v53 = vpop.eup %2706  ;;  %2710 = vpow2.f32 %v475_v51  ;;  %354 = vadd.xlane.f32.xlu0 %v353_v52 }
 0x572   :  { %v356_v54 = vsel %vm340_vm10, %v2707_v53, 0.0 }
 0x575   :  { %357 = vadd.xlane.f32.xlu0 %v356_v54 }
 0x577   :  { %v2709_v55 = vpop.eup %2708 }
 0x578   :  { %v477_v56 = vsel %vm340_vm10, %v2709_v55, 0.0 }
 0x579   :  { %478 = vadd.xlane.f32.xlu0 %v477_v56 }
 0x57b   :  { %v2711_v57 = vpop.eup %2710 }
 0x57c   :  { %v480_v58 = vsel %vm340_vm10, %v2711_v57, 0.0 }
 0x57d   :  { %481 = vadd.xlane.f32.xlu0 %v480_v58 }
 0x593   :  { %364 = vrot.lane.b32.xlu0 %v3011_v8, %s2825_s1 }
 0x597   :  { %634 = vrot.lane.b32.xlu0 %v3011_v8, %s2826_s20 }
 0x5fe   :  { %v355_v59 = vpop.xlane.xlu0 %354 }
 0x5ff   :  { %2712 = vrcp.f32 %v355_v59 }
 0x602   :  { %v358_v60 = vpop.xlane.xlu0 %357 }
 0x603   :  { %2714 = vrcp.f32 %v358_v60 }
 0x606   :  { %v479_v61 = vpop.xlane.xlu0 %478 }
 0x607   :  { %2716 = vrcp.f32 %v479_v61 }
 0x609   :  { %v2713_v63 = vpop.eup %2712 }
 0x60a   :  { %v482_v62 = vpop.xlane.xlu0 %481  ;;  %v360_v2 = vmul.f32 %v2713_v63, %v2705_v50 }
 0x60b   :  { %2718 = vrcp.f32 %v482_v62 }
 0x60d   :  { %v2715_v0 = vpop.eup %2714 }
 0x60e   :  { %v365_v1 = vpop.permute.xlu0 %364  ;;  %v362_v3 = vmul.f32 %v2715_v0, %v2707_v53 }
 0x60f   :  { %2464 = vmatpush3.bf16.msra.mxu0 %v365_v1 }
 0x610   :  { %v363_v4 = vpack.c.bf16 %v362_v3, %v360_v2  ;;  %2475 = vmatprep.subr.bf16.mxu0 %v2817_v11 }
 0x611   :  { %v2717_v6 = vpop.eup %2716 }
 0x612   :  { %2466 = vmatmul.mubr.msk.bf16.vlgmr.msra.gmra.mrb[0].mxu0 %vm340_vm10, %v363_v4  ;;  %v484_v10 = vmul.f32 %v2717_v6, %v2709_v55  ;;  %v635_v31 = vpop.permute.xlu0 %634 }
 0x613   :  { %2476 = vmatpush3.bf16.msra.mxu0 %v489_v5  ;;  %2477 = vmatprep.mubr.msk.bf16.mxu0 %vm2818_vm4, %v2817_v11  ;;  %v640_v35 = vsel %vm292_vm5, %v635_v31, 0 }
 0x614   :  { %2487 = vmatprep.subr.bf16.mxu0 %v2817_v11 }
 0x615   :  { %v2719_v7 = vpop.eup %2718 }
 0x616   :  { %v486_v12 = vmul.f32 %v2719_v7, %v2711_v57 }
 0x618   :  { %v487_v13 = vpack.c.bf16 %v486_v12, %v484_v10 }
 0x61a   :  { %2478 = vmatmul.mubr.msk.bf16.vlgmr.msra.gmra.mrb[4].mxu0 %vm340_vm10, %v487_v13 }
 0x61b   :  { %2489 = vmatprep.mubr.msk.bf16.mxu0 %vm2818_vm4, %v2817_v11  ;;  %2488 = vmatpush3.bf16.msra.mxu0 %v589_v19 }
 0x61c   :  { %2499 = vmatprep.subr.bf16.mxu0 %v2817_v11 }
 0x6e5   :  { %v404_v24 = vpop.f32.mrb[0].mxu0 }
 0x6e6   :  { %v2467_v25 = vpop.f32.mrb[1].mxu0 }
 0x6e7   :  { %v407_v28 = vpop.f32.mrb[2].mxu0 }
 0x6e8   :  { %v411_v16 = vpack.c.bf16 %v407_v28, %v404_v24  ;;  %v2468_v29 = vpop.f32.mrb[3].mxu0 }
 0x6ea   :  { %2490 = vmatmul.mubr.msk.bf16.vlgmr.msra.gmra.mrb[8].mxu0 %vm292_vm5, %v411_v16 }
 0x6eb   :  { %2501 = vmatprep.mubr.msk.bf16.mxu0 %vm2818_vm4, %v2817_v11 }
 0x6ed   :  { %v528_v30 = vpop.f32.mrb[4].mxu0 }
 0x6ee   :  { %v2479_v17 = vpop.f32.mrb[5].mxu0 }
 0x6ef   :  { %v531_v32 = vpop.f32.mrb[6].mxu0 }
 0x6f0   :  { %v535_v33 = vpack.c.bf16 %v531_v32, %v528_v30  ;;  %v2480_v34 = vpop.f32.mrb[7].mxu0 }
 0x6f2   :  { %2484 = vmatmul.mubr.msk.bf16.vlgmr.msra.gmra.mrb[16].mxu1 %vm292_vm5, %v535_v33 }
 0x6f3   :  { %2494 = vmatpush3.bf16.xpose.msra.mxu1 %v640_v35  ;;  %2495 = vmatprep.mubr.msk.bf16.mxu1 %vm2818_vm4, %v2817_v11 }
 0x6f4   :  { %2505 = vmatprep.subr.bf16.mxu1 %v2817_v11 }
 0x6fa   :  { %2496 = vmatmul.mubr.msk.bf16.vlgmr.msra.gmra.mrb[20].mxu1 %vm292_vm5, %v633_v36 }
 0x6fb   :  { %2507 = vmatprep.mubr.msk.bf16.mxu1 %vm2818_vm4, %v2817_v11  ;;  %2506 = vmatpush3.bf16.msra.mxu1 %v759_v18 }
 0x6fc   :  { %2517 = vmatprep.subr.bf16.mxu1 %v2817_v11 }
 0x7bd   :  { %v625_v37 = vpop.f32.mrb[8].mxu0 }
 0x7be   :  { %v2491_v38 = vpop.f32.mrb[9].mxu0 }
 0x7bf   :  { %v628_v39 = vpop.f32.mrb[10].mxu0 }
 0x7c0   :  { %v2492_v40 = vpop.f32.mrb[11].mxu0 }
 0x7c5   :  { %v578_v41 = vpop.f32.mrb[16].mxu1 }
 0x7c6   :  { %v3089_v42 = vadd.f32 %v625_v37, %v578_v41  ;;  %v2485_v43 = vpop.f32.mrb[17].mxu1 }
 0x7c7   :  { %v581_v44 = vpop.f32.mrb[18].mxu1 }
 0x7c8   :  { %v3091_v45 = vadd.f32 %v628_v39, %v581_v44  ;;  %v2486_v46 = vpop.f32.mrb[19].mxu1 }
 0x7c9   :  { %v284_v46 = vld [vmem:[%s3544_s7 + $0x18] sm:$0xff] }
 0x7cd   :  { %v676_v47 = vpop.f32.mrb[20].mxu1 }
 0x7ce   :  { %v677_v48 = vadd.f32 %v676_v47, %v3036_v21  ;;  %v2497_v49 = vpop.f32.mrb[21].mxu1  ;;  %v926_v47 = vpack.c.bf16 %v284_v46, %v284_v46 }
 0x7cf   :  { %v679_v50 = vpop.f32.mrb[22].mxu1 }
 0x7d0   :  { %v680_v51 = vadd.f32 %v679_v50, %v3038_v23  ;;  %v2498_v52 = vpop.f32.mrb[23].mxu1  ;;  %v683_v53 = vsel %vm340_vm10, %v677_v48, -inf }
 0x7d1   :  { %684 = vmax.xlane.f32.xlu0 %v683_v53 }
 0x7d2   :  { %v686_v54 = vsel %vm340_vm10, %v680_v51, -inf }
 0x7d3   :  { %687 = vmax.xlane.f32.xlu1 %v686_v54 }
 0x7e4   :  { %706 = vrot.lane.b32.xlu1 %v3011_v8, %s3560_s25 }
 0x7e8   :  { %804 = vrot.lane.b32.xlu1 %v3013_v9, %s3559_s26  ;;  %s3567_s26 = sld [smem:[#allocation7_spill]] }
 0x85e   :  { %v685_v55 = vpop.xlane.xlu0 %684 }
 0x85f   :  { %v689_v56 = vsub.f32 %v677_v48, %v685_v55  ;;  %v931_v48 = vsel %vm540_vm11, %v926_v47, 0 }
 0x860   :  { %v688_v57 = vpop.xlane.xlu1 %687 }
 0x861   :  { %v691_v58 = vmul.f32 1.442695, %v689_v56  ;;  %v690_v59 = vsub.f32 %v680_v51, %v688_v57 }
 0x863   :  { %2720 = vpow2.f32 %v691_v58  ;;  %v693_v60 = vmul.f32 1.442695, %v690_v59 }
 0x864   :  { %v707_v61 = vpop.permute.xlu1 %706 }
 0x865   :  { %2722 = vpow2.f32 %v693_v60  ;;  %2500 = vmatpush3.bf16.msra.mxu0 %v707_v61 }
 0x866   :  { %2511 = vmatprep.subr.bf16.mxu0 %v2817_v11 }
 0x868   :  { %v805_v13 = vpop.permute.xlu1 %804 }
 0x86d   :  { %v2721_v62 = vpop.eup %2720 }
 0x86e   :  { %v695_v63 = vsel %vm340_vm10, %v2721_v62, 0.0 }
 0x86f   :  { %v2723_v0 = vpop.eup %2722  ;;  %696 = vadd.xlane.f32.xlu0 %v695_v63 }
 0x870   :  { %v698_v1 = vsel %vm340_vm10, %v2723_v0, 0.0 }
 0x873   :  { %699 = vadd.xlane.f32.xlu0 %v698_v1 }
 0x889   :  { %806 = vrot.lane.b32.xlu0 %v3011_v8, %s3561_s27 }
 0x8fc   :  { %v697_v9 = vpop.xlane.xlu0 %696 }
 0x8fd   :  { %2724 = vrcp.f32 %v697_v9 }
 0x900   :  { %v700_v2 = vpop.xlane.xlu0 %699 }
 0x901   :  { %2726 = vrcp.f32 %v700_v2 }
 0x904   :  { %v807_v7 = vpop.permute.xlu0 %806 }
 0x905   :  { %v812_v12 = vsel %vm292_vm5, %v807_v7, 0 }
 0x907   :  { %v2725_v3 = vpop.eup %2724 }
 0x908   :  { %v702_v5 = vmul.f32 %v2725_v3, %v2721_v62  ;;  %v2276_v3 = vld [vmem:[%s3545_s8] ss:$0 sm:$0xff] }
 0x90b   :  { %v2727_v4 = vpop.eup %2726 }
 0x90c   :  { %v704_v6 = vmul.f32 %v2727_v4, %v2723_v0 }
 0x90e   :  { %v705_v10 = vpack.c.bf16 %v704_v6, %v702_v5 }
 0x910   :  { %2502 = vmatmul.mubr.msk.bf16.vlgmr.msra.gmra.mrb[12].mxu0 %vm340_vm10, %v705_v10 }
 0x911   :  { %2512 = vmatpush3.bf16.xpose.msra.mxu0 %v812_v12  ;;  %2513 = vmatprep.mubr.msk.bf16.mxu0 %vm2818_vm4, %v2817_v11 }
 0x912   :  { %2523 = vmatprep.subr.bf16.mxu0 %v2817_v11 }
 0x918   :  { %2514 = vmatmul.mubr.msk.bf16.vlgmr.msra.gmra.mrb[16].mxu0 %vm292_vm5, %v805_v13 }
 0x919   :  { %2525 = vmatprep.mubr.msk.bf16.mxu0 %vm2818_vm4, %v2817_v11  ;;  %2524 = vmatpush3.bf16.msra.mxu0 %v931_v48  ;;  %v2278_v48 = vld [vmem:[%s3547_s10] ss:$0 sm:$0xff] }
 0x91a   :  { %2537 = vmatprep.subr.bf16.mxu0 %v2817_v11 }
 0x9e3   :  { %v746_v19 = vpop.f32.mrb[12].mxu0 }
 0x9e4   :  { %v2503_v20 = vpop.f32.mrb[13].mxu0 }
 0x9e5   :  { %v749_v22 = vpop.f32.mrb[14].mxu0 }
 0x9e6   :  { %v753_v24 = vpack.c.bf16 %v749_v22, %v746_v19  ;;  %v2504_v25 = vpop.f32.mrb[15].mxu0 }
 0x9e8   :  { %2508 = vmatmul.mubr.msk.bf16.vlgmr.msra.gmra.mrb[24].mxu1 %vm292_vm5, %v753_v24 }
 0x9e9   :  { %2519 = vmatprep.mubr.msk.bf16.mxu1 %vm2818_vm4, %v2817_v11 }
 0x9eb   :  { %v848_v28 = vpop.f32.mrb[16].mxu0 }
 0x9ec   :  { %v849_v16 = vadd.f32 %v848_v28, %v3036_v21  ;;  %v2515_v29 = vpop.f32.mrb[17].mxu0 }
 0x9ed   :  { %v851_v30 = vpop.f32.mrb[18].mxu0  ;;  %v1032_v29 = vld [vmem:[%s3548_s11] sm:$0xff] }
 0x9ee   :  { %v852_v17 = vadd.f32 %v851_v30, %v3038_v23  ;;  %v2516_v31 = vpop.f32.mrb[19].mxu0  ;;  %v855_v32 = vsel %vm340_vm10, %v849_v16, -inf  ;;  %v1033_v30 = vld [vmem:[%s3548_s11 + $0x8] sm:$0xff] }
 0x9ef   :  { %856 = vmax.xlane.f32.xlu1 %v855_v32  ;;  %v1034_v31 = vld [vmem:[%s3548_s11 + $0x10] sm:$0xff]  ;;  %v1035_v32 = vld [vmem:[%s3548_s11 + $0x18] sm:$0xff] }
 0x9f0   :  { %v858_v33 = vsel %vm340_vm10, %v852_v17, -inf }
 0x9f1   :  { %859 = vmax.xlane.f32.xlu0 %v858_v33  ;;  %v1037_v33 = vpack.c.bf16 %v1035_v32, %v1034_v31 }
 0xa7c   :  { %v857_v34 = vpop.xlane.xlu1 %856 }
 0xa7d   :  { %v861_v35 = vsub.f32 %v849_v16, %v857_v34 }
 0xa7e   :  { %v860_v36 = vpop.xlane.xlu0 %859 }
 0xa7f   :  { %v863_v37 = vmul.f32 1.442695, %v861_v35  ;;  %v862_v38 = vsub.f32 %v852_v17, %v860_v36  ;;  %v1036_v17 = vpack.c.bf16 %v1033_v30, %v1032_v29 }
 0xa81   :  { %2728 = vpow2.f32 %v863_v37  ;;  %v865_v39 = vmul.f32 1.442695, %v862_v38 }
 0xa83   :  { %2730 = vpow2.f32 %v865_v39 }
 0xa8b   :  { %v2729_v40 = vpop.eup %2728 }
 0xa8c   :  { %v867_v41 = vsel %vm340_vm10, %v2729_v40, 0.0 }
 0xa8d   :  { %v2731_v43 = vpop.eup %2730  ;;  %868 = vadd.xlane.f32.xlu0 %v867_v41 }
 0xa8e   :  { %v870_v44 = vsel %vm340_vm10, %v2731_v43, 0.0 }
 0xa8f   :  { %871 = vadd.xlane.f32.xlu1 %v870_v44 }
 0xaa3   :  { %878 = vrot.lane.b32.xlu0 %v3011_v8, %s3558_s12 }
 0xabb   :  { %v795_v49 = vpop.f32.mrb[24].mxu1 }
 0xabc   :  { %v802_v50 = vadd.f32 %v795_v49, %v3089_v42  ;;  %v2509_v51 = vpop.f32.mrb[25].mxu1 }
 0xabd   :  { %v798_v52 = vpop.f32.mrb[26].mxu1 }
 0xabe   :  { %v803_v53 = vadd.f32 %v798_v52, %v3091_v45  ;;  %v2510_v54 = vpop.f32.mrb[27].mxu1 }
 0xabf   :  { %v1109_v54 = vld [vmem:[%s3550_s13 + $0x8] sm:$0xff] }
 0xb1a   :  { %v869_v55 = vpop.xlane.xlu0 %868 }
 0xb1b   :  { %2732 = vrcp.f32 %v869_v55 }
 0xb1c   :  { %v872_v8 = vpop.xlane.xlu1 %871 }
 0xb1d   :  { %2734 = vrcp.f32 %v872_v8  ;;  %v1110_v8 = vld [vmem:[%s3550_s13 + $0x10] sm:$0xff] }
 0xb1e   :  { %v879_v56 = vpop.permute.xlu0 %878 }
 0xb1f   :  { %2518 = vmatpush3.bf16.msra.mxu1 %v879_v56  ;;  %v1111_v56 = vld [vmem:[%s3550_s13 + $0x18] sm:$0xff] }
 0xb20   :  { %2529 = vmatprep.subr.bf16.mxu1 %v2817_v11 }
 0xb25   :  { %v2733_v57 = vpop.eup %2732 }
 0xb26   :  { %v874_v59 = vmul.f32 %v2733_v57, %v2729_v40  ;;  %v1125_v57 = vpack.c.bf16 %v1111_v56, %v1110_v8 }
 0xb27   :  { %v2735_v58 = vpop.eup %2734 }
 0xb28   :  { %v876_v60 = vmul.f32 %v2735_v58, %v2731_v43  ;;  %v2277_v43 = vld [vmem:[%s3546_s9] ss:$0 sm:$0xff] }
 0xb29   :  { %v1112_v58 = vld [vmem:[%s3550_s13 + $0x20] sm:$0xff] }
 0xb2a   :  { %v877_v61 = vpack.c.bf16 %v876_v60, %v874_v59  ;;  %v1113_v59 = vld [vmem:[%s3550_s13 + $0x28] sm:$0xff] }
 0xb2b   :  { %v1126_v60 = vpack.c.bf16 %v1113_v59, %v1112_v58 }
 0xb2c   :  { %2520 = vmatmul.mubr.msk.bf16.vlgmr.msra.gmra.mrb[28].mxu1 %vm340_vm10, %v877_v61  ;;  %v1114_v61 = vld [vmem:[%s3550_s13 + $0x30] sm:$0xff] }
 0xb2d   :  { %2533 = vmatprep.mubr.msk.bf16.mxu1 %vm2818_vm4, %v2817_v11  ;;  %2530 = vmatpush3.bf16.msra.mxu1 %v1036_v17 }
 0xb2e   :  { %2531 = vmatprep.subr.bf16.mxu1 %v2817_v11 }
 0xb31   :  { %2532 = vmatpush3.bf16.msra.mxu1 %v1037_v33 }
 0xb32   :  { %2557 = vmatprep.subr.bf16.mxu1 %v2817_v11 }
 0xbff   :  { %v918_v42 = vpop.f32.mrb[28].mxu1 }
 0xc00   :  { %v2521_v45 = vpop.f32.mrb[29].mxu1 }
 0xc01   :  { %v921_v62 = vpop.f32.mrb[30].mxu1 }
 0xc02   :  { %v925_v63 = vpack.c.bf16 %v921_v62, %v918_v42  ;;  %v2522_v0 = vpop.f32.mrb[31].mxu1  ;;  %v1115_v42 = vld [vmem:[%s3550_s13 + $0x38] sm:$0xff]  ;;  %v1116_v62 = vld [vmem:[%s3550_s13 + $0x40] sm:$0xff] }
 0xc03   :  { %v1127_v45 = vpack.c.bf16 %v1115_v42, %v1114_v61  ;;  %v1118_v0 = vld [vmem:[%s3550_s13 + $0x50] sm:$0xff]  ;;  %v2286_v42 = vld [vmem:[%s3542_s5 + $0x20] sm:$0xff] }
 0xc04   :  { %2526 = vmatmul.mubr.msk.bf16.vlgmr.msra.gmra.mrb[20].mxu0 %vm292_vm5, %v925_v63  ;;  %v1117_v63 = vld [vmem:[%s3550_s13 + $0x48] sm:$0xff] }
 0xc05   :  { %2553 = vmatprep.mubr.msk.bf16.mxu0 %vm2818_vm4, %v2817_v11 }
 0xcd7   :  { %v967_v1 = vpop.f32.mrb[20].mxu0 }
 0xcd8   :  { %v974_v9 = vadd.f32 %v967_v1, %v802_v50  ;;  %v2527_v2 = vpop.f32.mrb[21].mxu0  ;;  %v1128_v1 = vpack.c.bf16 %v1117_v63, %v1116_v62  ;;  %v2288_v63 = vld [vmem:[%s3542_s5 + $0x30] sm:$0xff] }
 0xcd9   :  { %v970_v4 = vpop.f32.mrb[22].mxu0 }
 0xcda   :  { %v976_v5 = vadd.f32 %v974_v9, %v2969_v26  ;;  %v975_v6 = vadd.f32 %v970_v4, %v803_v53  ;;  %v2528_v7 = vpop.f32.mrb[23].mxu0  ;;  %v1108_v53 = vld [vmem:[%s3550_s13] sm:$0xff]  ;;  %v1119_v9 = vld [vmem:[%s3550_s13 + $0x58] sm:$0xff]  ;;  %v1121_v4 = vld [vmem:[%s3550_s13 + $0x68] sm:$0xff] }
 0xcdb   :  { %v1124_v55 = vpack.c.bf16 %v1109_v54, %v1108_v53  ;;  %v1129_v2 = vpack.c.bf16 %v1119_v9, %v1118_v0  ;;  %v1123_v7 = vld [vmem:[%s3550_s13 + $0x78] sm:$0xff] }
 0xcdc   :  { %v3148_v10 = vadd.f32 %v2276_v3, %v976_v5  ;;  %v977_v12 = vadd.f32 %v975_v6, %v2971_v27  ;;  %v1122_v6 = vld [vmem:[%s3550_s13 + $0x70] sm:$0xff]  ;;  %v2289_v0 = vld [vmem:[%s3542_s5 + $0x38] sm:$0xff] }
 0xcdd   :  { %2538 = vmatpush3.bf16.msra.mxu0 %v1124_v55 }
 0xcde   :  { %v3151_v13 = vadd.f32 %v2276_v3, %v977_v12  ;;  %v989_v14 = vsel %vm179_vm3, %v3148_v10, 0.0  ;;  %2539 = vmatprep.subr.bf16.mxu0 %v2817_v11  ;;  %v1120_v3 = vld [vmem:[%s3550_s13 + $0x60] sm:$0xff]  ;;  %v1131_v12 = vpack.c.bf16 %v1123_v7, %v1122_v6 }
 0xcdf   :  { %990 = vadd.xlane.f32.xlu1 %v989_v14  ;;  %v1130_v5 = vpack.c.bf16 %v1121_v4, %v1120_v3  ;;  %v2279_v14 = vld [vmem:[%s3567_s26] ss:$0 sm:$0xff] }
 0xce0   :  { %v992_v15 = vsel %vm179_vm3, %v3151_v13, 0.0 }
 0xce1   :  { %2540 = vmatpush3.bf16.msra.mxu0 %v1125_v57 }
 0xce2   :  { %2541 = vmatprep.subr.bf16.mxu0 %v2817_v11 }
 0xce3   :  { %993 = vadd.xlane.f32.xlu1 %v992_v15 }
 0xce5   :  { %2542 = vmatpush3.bf16.msra.mxu0 %v1126_v60 }
 0xce6   :  { %2543 = vmatprep.subr.bf16.mxu0 %v2817_v11 }
 0xce9   :  { %2544 = vmatpush3.bf16.msra.mxu0 %v1127_v45  ;;  %v2287_v45 = vld [vmem:[%s3542_s5 + $0x28] sm:$0xff] }
 0xcea   :  { %2545 = vmatprep.subr.bf16.mxu0 %v2817_v11  ;;  %v1234_v62 = vpack.c.bf16 %v2287_v45, %v2286_v42 }
 0xced   :  { %2546 = vmatpush3.bf16.msra.mxu0 %v1128_v1  ;;  %v1235_v1 = vpack.c.bf16 %v2289_v0, %v2288_v63 }
 0xcee   :  { %2547 = vmatprep.subr.bf16.mxu0 %v2817_v11 }
 0xcf1   :  { %2548 = vmatpush3.bf16.msra.mxu0 %v1129_v2 }
 0xcf2   :  { %2549 = vmatprep.subr.bf16.mxu0 %v2817_v11 }
 0xcf5   :  { %2550 = vmatpush3.bf16.msra.mxu0 %v1130_v5 }
 0xcf6   :  { %2551 = vmatprep.subr.bf16.mxu0 %v2817_v11 }
 0xcf9   :  { %2552 = vmatpush3.bf16.msra.mxu0 %v1131_v12 }
 0xcfa   :  { %2583 = vmatprep.subr.bf16.mxu0 %v2817_v11 }
 0xd6c   :  { %v991_v18 = vpop.xlane.xlu1 %990 }
 0xd6d   :  { %v995_v19 = vmul.f32 0.03125, %v991_v18 }
 0xd6f   :  { %v997_v26 = vsub.f32 %v3148_v10, %v995_v19 }
 0xd70   :  { %v994_v20 = vpop.xlane.xlu1 %993 }
 0xd71   :  { %v996_v22 = vmul.f32 0.03125, %v994_v20  ;;  %v999_v24 = vmul.f32 %v997_v26, %v997_v26 }
 0xd73   :  { %v998_v25 = vsub.f32 %v3151_v13, %v996_v22  ;;  %v1001_v27 = vsel %vm179_vm3, %v999_v24, 0.0 }
 0xd74   :  { %1002 = vadd.xlane.f32.xlu1 %v1001_v27 }
 0xd75   :  { %v1000_v28 = vmul.f32 %v998_v25, %v998_v25 }
 0xd77   :  { %v1004_v16 = vsel %vm179_vm3, %v1000_v28, 0.0 }
 0xd78   :  { %1005 = vadd.xlane.f32.xlu1 %v1004_v16 }
 0xe01   :  { %v1003_v34 = vpop.xlane.xlu1 %1002 }
 0xe02   :  { %v1007_v35 = vmul.f32 0.03125, %v1003_v34 }
 0xe04   :  { %v1009_v36 = vadd.f32 1e-05, %v1007_v35 }
 0xe05   :  { %v1006_v37 = vpop.xlane.xlu1 %1005 }
 0xe06   :  { %2736 = vrsqrt.f32 %v1009_v36  ;;  %v1008_v38 = vmul.f32 0.03125, %v1006_v37 }
 0xe08   :  { %v1010_v39 = vadd.f32 1e-05, %v1008_v38 }
 0xe0a   :  { %2738 = vrsqrt.f32 %v1010_v39 }
 0xe10   :  { %v2737_v40 = vpop.eup %2736 }
 0xe11   :  { %v1013_v41 = vmul.f32 %v2737_v40, %v997_v26 }
 0xe13   :  { %v1021_v46 = vmul.f32 %v2277_v43, %v1013_v41 }
 0xe14   :  { %v2739_v44 = vpop.eup %2738 }
 0xe15   :  { %v1014_v47 = vmul.f32 %v2739_v44, %v998_v25  ;;  %v1029_v50 = vadd.f32 %v2278_v48, %v1021_v46 }
 0xe17   :  { %v1022_v49 = vmul.f32 %v2277_v43, %v1014_v47  ;;  %v2281_v43 = vld [vmem:[%s3551_s14] ss:$0 sm:$0xff] }
 0xe19   :  { %v1030_v51 = vadd.f32 %v2278_v48, %v1022_v49 }
 0xe1b   :  { %v1031_v52 = vpack.c.bf16 %v1030_v51, %v1029_v50 }
 0xe1d   :  { %2534 = vmatmul.mubr.msk.bf16.vlgmr.msra.gmra.mrb[32].mxu1 %vm179_vm3, %v1031_v52 }
 0xe1e   :  { %2561 = vmatprep.mubr.msk.bf16.mxu1 %vm2818_vm4, %v2817_v11  ;;  %2558 = vmatpush3.bf16.msra.mxu1 %v1234_v62 }
 0xe1f   :  { %2559 = vmatprep.subr.bf16.mxu1 %v2817_v11 }
 0xe22   :  { %2560 = vmatpush3.bf16.msra.mxu1 %v1235_v1 }
 0xe23   :  { %2565 = vmatprep.subr.bf16.mxu1 %v2817_v11 }
 0xef0   :  { %v1082_v15 = vpop.f32.mrb[32].mxu1 }
 0xef1   :  { %v1083_v18 = vadd.f32 %v2279_v14, %v1082_v15  ;;  %v2535_v19 = vpop.f32.mrb[33].mxu1 }
 0xef2   :  { %v1085_v26 = vpop.f32.mrb[34].mxu1 }
 0xef3   :  { %v1091_v20 = vmul.f32 0.044715, %v1083_v18  ;;  %v1086_v22 = vadd.f32 %v2279_v14, %v1085_v26  ;;  %v2536_v24 = vpop.f32.mrb[35].mxu1  ;;  %v1089_v36 = vmul.f32 0.5, %v1083_v18  ;;  %v2284_v14 = vld [vmem:[%s3540_s3 + $0x1] ss:$0 sm:$0xff] }
 0xef4   :  { %v2285_v26 = vld [vmem:[%s3541_s4 + $0x1] ss:$0 sm:$0xff] }
 0xef5   :  { %v1093_v25 = vmul.f32 %v1091_v20, %v1083_v18  ;;  %v1092_v27 = vmul.f32 0.044715, %v1086_v22  ;;  %v1090_v37 = vmul.f32 0.5, %v1086_v22 }
 0xef7   :  { %v1095_v28 = vmul.f32 %v1093_v25, %v1083_v18  ;;  %v1094_v16 = vmul.f32 %v1092_v27, %v1086_v22  ;;  %v2291_v27 = vld [vmem:[%s3543_s6 + $0x1] ss:$0 sm:$0xff] }
 0xef9   :  { %v1097_v29 = vadd.f32 %v1095_v28, %v1083_v18  ;;  %v1096_v30 = vmul.f32 %v1094_v16, %v1086_v22 }
 0xefb   :  { %v1099_v17 = vmul.f32 0.7978846, %v1097_v29  ;;  %v1098_v31 = vadd.f32 %v1096_v30, %v1086_v22 }
 0xefd   :  { %2740 = vtanh.f32 %v1099_v17  ;;  %v1100_v32 = vmul.f32 0.7978846, %v1098_v31 }
 0xeff   :  { %2742 = vtanh.f32 %v1100_v32 }
 0xf07   :  { %v2741_v33 = vpop.eup %2740 }
 0xf08   :  { %v1103_v34 = vadd.f32 1.0, %v2741_v33 }
 0xf09   :  { %v2743_v35 = vpop.eup %2742 }
 0xf0a   :  { %v1104_v38 = vadd.f32 1.0, %v2743_v35  ;;  %v1105_v39 = vmul.f32 %v1103_v34, %v1089_v36 }
 0xf0c   :  { %v1106_v40 = vmul.f32 %v1104_v38, %v1090_v37 }
 0xf0e   :  { %v1107_v41 = vpack.c.bf16 %v1106_v40, %v1105_v39 }
 0xf10   :  { %2554 = vmatmul.mubr.bf16.vlgmr.msra.gmra.mrb[24].mxu0 %v1107_v41 }
 0xf11   :  { %2585 = vmatprep.mubr.msk.bf16.mxu0 %vm2818_vm4, %v2817_v11 }
 0xfe3   :  { %v1173_v44 = vpop.f32.mrb[24].mxu0 }
 0xfe4   :  { %v1174_v46 = vadd.f32 %v2281_v43, %v1173_v44  ;;  %v2555_v47 = vpop.f32.mrb[25].mxu0 }
 0xfe5   :  { %v1176_v48 = vpop.f32.mrb[26].mxu0 }
 0xfe6   :  { %v3249_v49 = vadd.f32 %v1174_v46, %v3148_v10  ;;  %v1177_v50 = vadd.f32 %v2281_v43, %v1176_v48  ;;  %v2556_v51 = vpop.f32.mrb[27].mxu0 }
 0xfe8   :  { %v3252_v52 = vadd.f32 %v1177_v50, %v3151_v13  ;;  %v1186_v53 = vsel %vm179_vm3, %v3249_v49, 0.0 }
 0xfe9   :  { %1187 = vadd.xlane.f32.xlu1 %v1186_v53 }
 0xfea   :  { %v1189_v54 = vsel %vm179_vm3, %v3252_v52, 0.0 }
 0xfeb   :  { %1190 = vadd.xlane.f32.xlu0 %v1189_v54 }
0x1076   :  { %v1188_v55 = vpop.xlane.xlu1 %1187 }
0x1077   :  { %v1192_v8 = vmul.f32 0.03125, %v1188_v55 }
0x1078   :  { %v1191_v56 = vpop.xlane.xlu0 %1190 }
0x1079   :  { %v1194_v57 = vsub.f32 %v3249_v49, %v1192_v8  ;;  %v1193_v10 = vmul.f32 0.03125, %v1191_v56 }
0x107b   :  { %v1195_v58 = vsub.f32 %v3252_v52, %v1193_v10  ;;  %v1196_v59 = vmul.f32 %v1194_v57, %v1194_v57 }
0x107d   :  { %v1198_v13 = vsel %vm179_vm3, %v1196_v59, 0.0  ;;  %v1197_v60 = vmul.f32 %v1195_v58, %v1195_v58 }
0x107e   :  { %1199 = vadd.xlane.f32.xlu1 %v1198_v13 }
0x107f   :  { %v1201_v61 = vsel %vm179_vm3, %v1197_v60, 0.0 }
0x1082   :  { %1202 = vadd.xlane.f32.xlu1 %v1201_v61 }
0x110b   :  { %v1200_v9 = vpop.xlane.xlu1 %1199 }
0x110c   :  { %v1204_v2 = vmul.f32 0.03125, %v1200_v9 }
0x110e   :  { %v1206_v3 = vadd.f32 1e-05, %v1204_v2 }
0x110f   :  { %v1203_v4 = vpop.xlane.xlu1 %1202 }
0x1110   :  { %2744 = vrsqrt.f32 %v1206_v3  ;;  %v1205_v5 = vmul.f32 0.03125, %v1203_v4 }
0x1112   :  { %v1207_v6 = vadd.f32 1e-05, %v1205_v5 }
0x1114   :  { %2746 = vrsqrt.f32 %v1207_v6 }
0x111a   :  { %v2745_v7 = vpop.eup %2744 }
0x111b   :  { %v1210_v12 = vmul.f32 %v2745_v7, %v1194_v57 }
0x111d   :  { %v1218_v18 = vmul.f32 %v2284_v14, %v1210_v12 }
0x111e   :  { %v2747_v15 = vpop.eup %2746 }
0x111f   :  { %v1211_v19 = vmul.f32 %v2747_v15, %v1195_v58  ;;  %v1226_v22 = vadd.f32 %v2285_v26, %v1218_v18 }
0x1121   :  { %v1219_v20 = vmul.f32 %v2284_v14, %v1211_v19 }
0x1123   :  { %v1227_v24 = vadd.f32 %v2285_v26, %v1219_v20 }
0x1125   :  { %v1228_v25 = vpack.c.bf16 %v1227_v24, %v1226_v22 }
0x1127   :  { %2562 = vmatmul.mubr.msk.bf16.vlgmr.msra.gmra.mrb[36].mxu1 %vm179_vm3, %v1228_v25 }
0x1128   :  { %2567 = vmatprep.mubr.msk.bf16.mxu1 %vm2818_vm4, %v2817_v11 }
0x11fa   :  { %v1281_v28 = vpop.f32.mrb[36].mxu1 }
0x11fb   :  { %v1282_v16 = vadd.f32 %v2291_v27, %v1281_v28  ;;  %v2563_v29 = vpop.f32.mrb[37].mxu1 }
0x11fc   :  { %v1284_v30 = vpop.f32.mrb[38].mxu1 }
0x11fd   :  { %v1285_v17 = vadd.f32 %v2291_v27, %v1284_v30  ;;  %v2564_v31 = vpop.f32.mrb[39].mxu1  ;;  %v1293_v32 = vmul.f32 0.35355338, %v1282_v16 }
0x11fe   :  { %v2294_v31 = vld [vmem:[%s3544_s7 + $0x28] sm:$0xff] }
0x11ff   :  { %v1294_v33 = vmul.f32 0.35355338, %v1285_v17  ;;  %v3288_v34 = vpack.c.bf16 %v1285_v17, %v1282_v16 }
0x1201   :  { %v3290_v35 = vpack.c.bf16 %v1294_v33, %v1293_v32  ;;  %1298 = vrot.lane.b32.xlu1 %v3288_v34, %s2819_s0  ;;  %v1542_v32 = vpack.c.bf16 %v2294_v31, %v2294_v31 }
0x1203   :  { %v1547_v33 = vsel %vm540_vm11, %v1542_v32, 0 }
0x1273   :  { %v1299_v36 = vpop.permute.xlu1 %1298 }
0x1274   :  { %v1304_v37 = vsel %vm292_vm5, %v1299_v36, 0 }
0x1275   :  { %2566 = vmatpush3.bf16.xpose.msra.mxu1 %v1304_v37 }
0x1276   :  { %2571 = vmatprep.subr.bf16.mxu1 %v2817_v11 }
0x127c   :  { %2568 = vmatmul.mubr.msk.bf16.vlgmr.msra.gmra.mrb[40].mxu1 %vm292_vm5, %v3290_v35 }
0x127d   :  { %2573 = vmatprep.mubr.msk.bf16.mxu1 %vm2818_vm4, %v2817_v11 }
0x134f   :  { %v1340_v38 = vpop.f32.mrb[40].mxu1 }
0x1350   :  { %v1341_v39 = vadd.f32 %v1340_v38, %v3036_v21  ;;  %v2569_v40 = vpop.f32.mrb[41].mxu1 }
0x1351   :  { %v1343_v41 = vpop.f32.mrb[42].mxu1 }
0x1352   :  { %v1344_v43 = vadd.f32 %v1343_v41, %v3038_v23  ;;  %v2570_v44 = vpop.f32.mrb[43].mxu1  ;;  %v1347_v46 = vsel %vm340_vm10, %v1341_v39, -inf }
0x1353   :  { %1348 = vmax.xlane.f32.xlu1 %v1347_v46 }
0x1354   :  { %v1350_v47 = vsel %vm340_vm10, %v1344_v43, -inf }
0x1355   :  { %1351 = vmax.xlane.f32.xlu0 %v1350_v47 }
0x1364   :  { %1422 = vrot.lane.b32.xlu1 %v3288_v34, %s2820_s30  ;;  %s3568_s30 = smov 72  }
0x13e0   :  { %v1349_v48 = vpop.xlane.xlu1 %1348 }
0x13e1   :  { %v1353_v50 = vsub.f32 %v1341_v39, %v1349_v48  ;;  %v2293_v39 = vld [vmem:[%s3544_s7 + $0x20] sm:$0xff] }
0x13e2   :  { %v1352_v51 = vpop.xlane.xlu0 %1351  ;;  %v1418_v41 = vpack.c.bf16 %v2293_v39, %v2293_v39 }
0x13e3   :  { %v1355_v53 = vmul.f32 1.442695, %v1353_v50  ;;  %v1354_v54 = vsub.f32 %v1344_v43, %v1352_v51 }
0x13e4   :  { %v1423_v62 = vpop.permute.xlu1 %1422  ;;  %v1594_v48 = vsel %vm540_vm11, %v1418_v41, 0 }
0x13e5   :  { %2748 = vpow2.f32 %v1355_v53  ;;  %v1357_v55 = vmul.f32 1.442695, %v1354_v54  ;;  %v1428_v0 = vsel %vm292_vm5, %v1423_v62, 0 }
0x13e7   :  { %2750 = vpow2.f32 %v1357_v55 }
0x13ef   :  { %v2749_v8 = vpop.eup %2748 }
0x13f0   :  { %v1359_v56 = vsel %vm340_vm10, %v2749_v8, 0.0 }
0x13f1   :  { %v2751_v57 = vpop.eup %2750  ;;  %1360 = vadd.xlane.f32.xlu0 %v1359_v56 }
0x13f2   :  { %v1362_v10 = vsel %vm340_vm10, %v2751_v57, 0.0 }
0x13f5   :  { %1363 = vadd.xlane.f32.xlu0 %v1362_v10 }
0x140b   :  { %1370 = vrot.lane.b32.xlu0 %v3288_v34, %s2825_s1 }
0x140f   :  { %1420 = vrot.lane.b32.xlu0 %v3290_v35, %s2821_s18  ;;  %s3569_s18 = smov 48  }
0x147e   :  { %v1361_v58 = vpop.xlane.xlu0 %1360 }
0x147f   :  { %2752 = vrcp.f32 %v1361_v58 }
0x1482   :  { %v1364_v59 = vpop.xlane.xlu0 %1363 }
0x1483   :  { %2754 = vrcp.f32 %v1364_v59 }
0x1486   :  { %v1371_v13 = vpop.permute.xlu0 %1370 }
0x1487   :  { %2572 = vmatpush3.bf16.msra.mxu1 %v1371_v13 }
0x1488   :  { %2577 = vmatprep.subr.bf16.mxu1 %v2817_v11 }
0x1489   :  { %v2753_v60 = vpop.eup %2752 }
0x148a   :  { %v1366_v42 = vmul.f32 %v2753_v60, %v2749_v8  ;;  %v1421_v1 = vpop.permute.xlu0 %1420 }
0x148d   :  { %v2755_v61 = vpop.eup %2754 }
0x148e   :  { %v1368_v45 = vmul.f32 %v2755_v61, %v2751_v57 }
0x1490   :  { %v1369_v63 = vpack.c.bf16 %v1368_v45, %v1366_v42 }
0x1492   :  { %2574 = vmatmul.mubr.msk.bf16.vlgmr.msra.gmra.mrb[44].mxu1 %vm340_vm10, %v1369_v63 }
0x1493   :  { %2578 = vmatpush3.bf16.xpose.msra.mxu1 %v1428_v0  ;;  %2579 = vmatprep.mubr.msk.bf16.mxu1 %vm2818_vm4, %v2817_v11 }
0x1494   :  { %2589 = vmatprep.subr.bf16.mxu1 %v2817_v11 }
0x149a   :  { %2580 = vmatmul.mubr.msk.bf16.vlgmr.msra.gmra.mrb[48].mxu1 %vm292_vm5, %v1421_v1 }
0x149b   :  { %2591 = vmatprep.mubr.msk.bf16.mxu1 %vm2818_vm4, %v2817_v11  ;;  %2590 = vmatpush3.bf16.msra.mxu1 %v1547_v33 }
0x149c   :  { %2601 = vmatprep.subr.bf16.mxu1 %v2817_v11 }
0x1565   :  { %v1410_v9 = vpop.f32.mrb[44].mxu1 }
0x1566   :  { %v2575_v2 = vpop.f32.mrb[45].mxu1 }
0x1567   :  { %v1413_v3 = vpop.f32.mrb[46].mxu1 }
0x1568   :  { %v1417_v4 = vpack.c.bf16 %v1413_v3, %v1410_v9  ;;  %v2576_v5 = vpop.f32.mrb[47].mxu1 }
0x156d   :  { %v1464_v6 = vpop.f32.mrb[48].mxu1 }
0x156e   :  { %v1465_v7 = vadd.f32 %v1464_v6, %v3036_v21  ;;  %v2581_v12 = vpop.f32.mrb[49].mxu1 }
0x156f   :  { %v1467_v14 = vpop.f32.mrb[50].mxu1 }
0x1570   :  { %v1468_v15 = vadd.f32 %v1467_v14, %v3038_v23  ;;  %v2582_v18 = vpop.f32.mrb[51].mxu1  ;;  %v1471_v19 = vsel %vm340_vm10, %v1465_v7, -inf }
0x1571   :  { %1472 = vmax.xlane.f32.xlu0 %v1471_v19 }
0x1572   :  { %v1474_v26 = vsel %vm340_vm10, %v1468_v15, -inf }
0x1573   :  { %1475 = vmax.xlane.f32.xlu1 %v1474_v26 }
0x1584   :  { %1639 = vrot.lane.b32.xlu1 %v3288_v34, %s2826_s20  ;;  %s3571_s20 = smov 40  }
0x15fe   :  { %v1473_v20 = vpop.xlane.xlu0 %1472 }
0x15ff   :  { %v1477_v22 = vsub.f32 %v1465_v7, %v1473_v20 }
0x1600   :  { %v1476_v24 = vpop.xlane.xlu1 %1475 }
0x1601   :  { %v1479_v25 = vmul.f32 1.442695, %v1477_v22  ;;  %v1478_v27 = vsub.f32 %v1468_v15, %v1476_v24 }
0x1603   :  { %2756 = vpow2.f32 %v1479_v25  ;;  %v1481_v28 = vmul.f32 1.442695, %v1478_v27 }
0x1604   :  { %v1640_v53 = vpop.permute.xlu1 %1639 }
0x1605   :  { %2758 = vpow2.f32 %v1481_v28  ;;  %v1645_v56 = vsel %vm292_vm5, %v1640_v53, 0 }
0x160d   :  { %v2757_v16 = vpop.eup %2756 }
0x160e   :  { %v1483_v29 = vsel %vm340_vm10, %v2757_v16, 0.0 }
0x160f   :  { %v2759_v30 = vpop.eup %2758  ;;  %1484 = vadd.xlane.f32.xlu0 %v1483_v29 }
0x1610   :  { %v1486_v17 = vsel %vm340_vm10, %v2759_v30, 0.0 }
0x1613   :  { %1487 = vadd.xlane.f32.xlu0 %v1486_v17 }
0x1629   :  { %1494 = vrot.lane.b32.xlu0 %v3288_v34, %s2823_s2  ;;  %s3570_s2 = smov 104  }
0x162d   :  { %1637 = vrot.lane.b32.xlu0 %v3290_v35, %s2824_s19 }
0x169c   :  { %v1485_v36 = vpop.xlane.xlu0 %1484 }
0x169d   :  { %2760 = vrcp.f32 %v1485_v36  ;;  %v2295_v36 = vld [vmem:[%s3544_s7 + $0x30] sm:$0xff] }
0x16a0   :  { %v1488_v37 = vpop.xlane.xlu0 %1487 }
0x16a1   :  { %2762 = vrcp.f32 %v1488_v37  ;;  %v1759_v37 = vpack.c.bf16 %v2295_v36, %v2295_v36 }
0x16a4   :  { %v1495_v38 = vpop.permute.xlu0 %1494 }
0x16a5   :  { %2584 = vmatpush3.bf16.msra.mxu0 %v1495_v38  ;;  %v1764_v38 = vsel %vm540_vm11, %v1759_v37, 0 }
0x16a6   :  { %2595 = vmatprep.subr.bf16.mxu0 %v2817_v11 }
0x16a7   :  { %v2761_v40 = vpop.eup %2760 }
0x16a8   :  { %v1490_v44 = vmul.f32 %v2761_v40, %v2757_v16  ;;  %v1638_v13 = vpop.permute.xlu0 %1637 }
0x16ab   :  { %v2763_v43 = vpop.eup %2762 }
0x16ac   :  { %v1492_v46 = vmul.f32 %v2763_v43, %v2759_v30 }
0x16ae   :  { %v1493_v47 = vpack.c.bf16 %v1492_v46, %v1490_v44 }
0x16b0   :  { %2586 = vmatmul.mubr.msk.bf16.vlgmr.msra.gmra.mrb[28].mxu0 %vm340_vm10, %v1493_v47 }
0x16b1   :  { %2596 = vmatpush3.bf16.msra.mxu0 %v1594_v48  ;;  %2597 = vmatprep.mubr.msk.bf16.mxu0 %vm2818_vm4, %v2817_v11 }
0x16b2   :  { %2607 = vmatprep.subr.bf16.mxu0 %v2817_v11 }
0x16b8   :  { %2598 = vmatmul.mubr.msk.bf16.vlgmr.msra.gmra.mrb[32].mxu0 %vm292_vm5, %v1417_v4 }
0x16b9   :  { %2609 = vmatprep.mubr.msk.bf16.mxu0 %vm2818_vm4, %v2817_v11 }
0x1783   :  { %v1534_v50 = vpop.f32.mrb[28].mxu0 }
0x1784   :  { %v2587_v51 = vpop.f32.mrb[29].mxu0 }
0x1785   :  { %v1537_v54 = vpop.f32.mrb[30].mxu0 }
0x1786   :  { %v1541_v55 = vpack.c.bf16 %v1537_v54, %v1534_v50  ;;  %v2588_v8 = vpop.f32.mrb[31].mxu0 }
0x1788   :  { %2592 = vmatmul.mubr.msk.bf16.vlgmr.msra.gmra.mrb[52].mxu1 %vm292_vm5, %v1541_v55 }
0x1789   :  { %2602 = vmatpush3.bf16.xpose.msra.mxu1 %v1645_v56  ;;  %2603 = vmatprep.mubr.msk.bf16.mxu1 %vm2818_vm4, %v2817_v11 }
0x178a   :  { %2613 = vmatprep.subr.bf16.mxu1 %v2817_v11 }
0x178b   :  { %v1630_v57 = vpop.f32.mrb[32].mxu0 }
0x178c   :  { %v2599_v10 = vpop.f32.mrb[33].mxu0 }
0x178d   :  { %v1633_v58 = vpop.f32.mrb[34].mxu0 }
0x178e   :  { %v2600_v59 = vpop.f32.mrb[35].mxu0 }
0x1790   :  { %2604 = vmatmul.mubr.msk.bf16.vlgmr.msra.gmra.mrb[56].mxu1 %vm292_vm5, %v1638_v13 }
0x1791   :  { %2615 = vmatprep.mubr.msk.bf16.mxu1 %vm2818_vm4, %v2817_v11  ;;  %2614 = vmatpush3.bf16.msra.mxu1 %v1764_v38 }
0x1792   :  { %2625 = vmatprep.subr.bf16.mxu1 %v2817_v11 }
0x185b   :  { %v1583_v60 = vpop.f32.mrb[52].mxu1 }
0x185c   :  { %v3358_v61 = vadd.f32 %v1630_v57, %v1583_v60  ;;  %v2593_v42 = vpop.f32.mrb[53].mxu1 }
0x185d   :  { %v1586_v45 = vpop.f32.mrb[54].mxu1 }
0x185e   :  { %v3360_v62 = vadd.f32 %v1633_v58, %v1586_v45  ;;  %v2594_v63 = vpop.f32.mrb[55].mxu1 }
0x1863   :  { %v1681_v0 = vpop.f32.mrb[56].mxu1 }
0x1864   :  { %v1682_v1 = vadd.f32 %v1681_v0, %v3036_v21  ;;  %v2605_v9 = vpop.f32.mrb[57].mxu1 }
0x1865   :  { %v1684_v2 = vpop.f32.mrb[58].mxu1 }
0x1866   :  { %v1685_v3 = vadd.f32 %v1684_v2, %v3038_v23  ;;  %v2606_v4 = vpop.f32.mrb[59].mxu1  ;;  %v1688_v5 = vsel %vm340_vm10, %v1682_v1, -inf }
0x1867   :  { %1689 = vmax.xlane.f32.xlu1 %v1688_v5 }
0x1868   :  { %v1691_v6 = vsel %vm340_vm10, %v1685_v3, -inf }
0x1869   :  { %1692 = vmax.xlane.f32.xlu0 %v1691_v6 }
0x18f4   :  { %v1690_v7 = vpop.xlane.xlu1 %1689 }
0x18f5   :  { %v1694_v12 = vsub.f32 %v1682_v1, %v1690_v7 }
0x18f6   :  { %v1693_v14 = vpop.xlane.xlu0 %1692 }
0x18f7   :  { %v1696_v15 = vmul.f32 1.442695, %v1694_v12  ;;  %v1695_v18 = vsub.f32 %v1685_v3, %v1693_v14 }
0x18f9   :  { %2764 = vpow2.f32 %v1696_v15  ;;  %v1698_v19 = vmul.f32 1.442695, %v1695_v18 }
0x18fb   :  { %2766 = vpow2.f32 %v1698_v19 }
0x1903   :  { %v2765_v26 = vpop.eup %2764 }
0x1904   :  { %v1700_v20 = vsel %vm340_vm10, %v2765_v26, 0.0 }
0x1905   :  { %v2767_v22 = vpop.eup %2766  ;;  %1701 = vadd.xlane.f32.xlu0 %v1700_v20 }
0x1906   :  { %v1703_v24 = vsel %vm340_vm10, %v2767_v22, 0.0 }
0x1907   :  { %1704 = vadd.xlane.f32.xlu1 %v1703_v24 }
0x1918   :  { %1811 = vrot.lane.b32.xlu1 %v3288_v34, %s3568_s30 }
0x191b   :  { %1711 = vrot.lane.b32.xlu0 %v3288_v34, %s3569_s18 }
0x191c   :  { %1809 = vrot.lane.b32.xlu1 %v3290_v35, %s3570_s2 }
0x1992   :  { %v1702_v25 = vpop.xlane.xlu0 %1701 }
0x1993   :  { %2768 = vrcp.f32 %v1702_v25 }
0x1994   :  { %v1705_v27 = vpop.xlane.xlu1 %1704 }
0x1995   :  { %2770 = vrcp.f32 %v1705_v27  ;;  %v2310_v27 = vld [vmem:[%s3545_s8 + $0x1] ss:$0 sm:$0xff]  ;;  %s2245_s8 = sshll.u32 %s2831_s29, 4  ;;  %s2246_s8 = int_to_ptr.vmem [resolvable:$true] %s2245_s8 }
0x1996   :  { %v1712_v28 = vpop.permute.xlu0 %1711  ;;  %s2792_s12 = scalar_lea.vmem %s2246_s8, 256  ;;  %p2797_p1 = scmp.lt.s32.totalorder %s2246_s8, %s2246_s8 }
0x1997   :  { %2608 = vmatpush3.bf16.msra.mxu0 %v1712_v28  ;;  %p2793_p0 = scmp.ne.s32.totalorder %s2246_s8, %s2792_s12  ;;  %p2798_p2 = scmp.lt.s32.totalorder %s2792_s12, %s2792_s12 }
0x1998   :  { %2619 = vmatprep.subr.bf16.mxu0 %v2817_v11  ;;  %v1812_v31 = vpop.permute.xlu1 %1811 }
0x1999   :  { %v1817_v33 = vsel %vm292_vm5, %v1812_v31, 0  ;;  %p2799_p3 = por %p2798_p2, %p2797_p1 }
0x199b   :  { %p2800_p4 = pnand %p2799_p3, %p2793_p0 }
0x199c   :  { %v1810_v35 = vpop.permute.xlu1 %1809 }
0x199d   :  { %v2769_v16 = vpop.eup %2768 }
0x199e   :  { %v1707_v30 = vmul.f32 %v2769_v16, %v2765_v26 }
0x199f   :  { %v2771_v29 = vpop.eup %2770 }
0x19a0   :  { %v1709_v17 = vmul.f32 %v2771_v29, %v2767_v22 }
0x19a2   :  { %v1710_v32 = vpack.c.bf16 %v1709_v17, %v1707_v30 }
0x19a4   :  { %2610 = vmatmul.mubr.msk.bf16.vlgmr.msra.gmra.mrb[36].mxu0 %vm340_vm10, %v1710_v32 }
0x19a5   :  { %2620 = vmatpush3.bf16.xpose.msra.mxu0 %v1817_v33  ;;  %2621 = vmatprep.mubr.msk.bf16.mxu0 %vm2818_vm4, %v2817_v11 }
0x19a6   :  { %2631 = vmatprep.subr.bf16.mxu0 %v2817_v11 }
0x19ac   :  { %2622 = vmatmul.mubr.msk.bf16.vlgmr.msra.gmra.mrb[40].mxu0 %vm292_vm5, %v1810_v35 }
0x19ad   :  { %2633 = vmatprep.mubr.msk.bf16.mxu0 %vm2818_vm4, %v2817_v11 }
0x1a77   :  { %v1751_v39 = vpop.f32.mrb[36].mxu0 }
0x1a78   :  { %v2611_v40 = vpop.f32.mrb[37].mxu0 }
0x1a79   :  { %v1754_v41 = vpop.f32.mrb[38].mxu0 }
0x1a7a   :  { %v1758_v43 = vpack.c.bf16 %v1754_v41, %v1751_v39  ;;  %v2612_v44 = vpop.f32.mrb[39].mxu0 }
0x1a7c   :  { %2616 = vmatmul.mubr.msk.bf16.vlgmr.msra.gmra.mrb[60].mxu1 %vm292_vm5, %v1758_v43 }
0x1a7d   :  { %2627 = vmatprep.mubr.msk.bf16.mxu1 %vm2818_vm4, %v2817_v11 }
0x1a7f   :  { %v1853_v46 = vpop.f32.mrb[40].mxu0 }
0x1a80   :  { %v1854_v47 = vadd.f32 %v1853_v46, %v3036_v21  ;;  %v2623_v48 = vpop.f32.mrb[41].mxu0  ;;  %v2315_v46 = vld [vmem:[%s3548_s11 + $0x20] sm:$0xff] }
0x1a81   :  { %v1856_v50 = vpop.f32.mrb[42].mxu0 }
0x1a82   :  { %v1857_v51 = vadd.f32 %v1856_v50, %v3038_v23  ;;  %v2624_v53 = vpop.f32.mrb[43].mxu0  ;;  %v1860_v54 = vsel %vm340_vm10, %v1854_v47, -inf  ;;  %v2317_v50 = vld [vmem:[%s3548_s11 + $0x30] sm:$0xff] }
0x1a83   :  { %1861 = vmax.xlane.f32.xlu0 %v1860_v54 }
0x1a84   :  { %v1863_v55 = vsel %vm340_vm10, %v1857_v51, -inf }
0x1a85   :  { %1864 = vmax.xlane.f32.xlu1 %v1863_v55 }
0x1a96   :  { %1883 = vrot.lane.b32.xlu1 %v3288_v34, %s3571_s20  ;;  %v2296_v34 = vld [vmem:[%s3544_s7 + $0x38] sm:$0xff] }
0x1a97   :  { %v1931_v45 = vpack.c.bf16 %v2296_v34, %v2296_v34 }
0x1a99   :  { %v1936_v63 = vsel %vm540_vm11, %v1931_v45, 0 }
0x1a9a   :  { %2632 = vmatpush3.bf16.msra.mxu0 %v1936_v63 }
0x1a9b   :  { %2645 = vmatprep.subr.bf16.mxu0 %v2817_v11 }
0x1b10   :  { %v1862_v8 = vpop.xlane.xlu0 %1861 }
0x1b11   :  { %v1866_v56 = vsub.f32 %v1854_v47, %v1862_v8  ;;  %v2316_v47 = vld [vmem:[%s3548_s11 + $0x28] sm:$0xff] }
0x1b12   :  { %v1865_v57 = vpop.xlane.xlu1 %1864  ;;  %v2045_v48 = vpack.c.bf16 %v2316_v47, %v2315_v46 }
0x1b13   :  { %v1868_v10 = vmul.f32 1.442695, %v1866_v56  ;;  %v1867_v58 = vsub.f32 %v1857_v51, %v1865_v57  ;;  %v2318_v51 = vld [vmem:[%s3548_s11 + $0x38] sm:$0xff] }
0x1b14   :  { %v2046_v53 = vpack.c.bf16 %v2318_v51, %v2317_v50 }
0x1b15   :  { %2772 = vpow2.f32 %v1868_v10  ;;  %v1870_v21 = vmul.f32 1.442695, %v1867_v58 }
0x1b16   :  { %v1884_v59 = vpop.permute.xlu1 %1883 }
0x1b17   :  { %2774 = vpow2.f32 %v1870_v21  ;;  %2626 = vmatpush3.bf16.msra.mxu1 %v1884_v59  ;;  %v2313_v59 = vld [vmem:[%s3546_s9 + $0x1] ss:$0 sm:$0xff] }
0x1b18   :  { %2637 = vmatprep.subr.bf16.mxu1 %v2817_v11 }
0x1b1f   :  { %v2773_v23 = vpop.eup %2772 }
0x1b20   :  { %v1872_v13 = vsel %vm340_vm10, %v2773_v23, 0.0 }
0x1b21   :  { %v2775_v60 = vpop.eup %2774  ;;  %1873 = vadd.xlane.f32.xlu0 %v1872_v13 }
0x1b22   :  { %v1875_v42 = vsel %vm340_vm10, %v2775_v60, 0.0 }
0x1b25   :  { %1876 = vadd.xlane.f32.xlu0 %v1875_v42  ;;  %v2314_v42 = vld [vmem:[%s3547_s10 + $0x1] ss:$0 sm:$0xff] }
0x1b4f   :  { %v1800_v0 = vpop.f32.mrb[60].mxu1 }
0x1b50   :  { %v1807_v1 = vadd.f32 %v1800_v0, %v3358_v61  ;;  %v2617_v9 = vpop.f32.mrb[61].mxu1 }
0x1b51   :  { %v1803_v2 = vpop.f32.mrb[62].mxu1  ;;  %v2323_v9 = vld [vmem:[%s3550_s13 + $0x88] sm:$0xff] }
0x1b52   :  { %v1808_v3 = vadd.f32 %v1803_v2, %v3360_v62  ;;  %v2618_v4 = vpop.f32.mrb[63].mxu1 }
0x1b53   :  { %v2325_v4 = vld [vmem:[%s3550_s13 + $0x98] sm:$0xff] }
0x1bae   :  { %v1874_v5 = vpop.xlane.xlu0 %1873 }
0x1baf   :  { %2776 = vrcp.f32 %v1874_v5 }
0x1bb2   :  { %v1877_v6 = vpop.xlane.xlu0 %1876 }
0x1bb3   :  { %2778 = vrcp.f32 %v1877_v6  ;;  %v2326_v6 = vld [vmem:[%s3550_s13 + $0xa0] sm:$0xff] }
0x1bb9   :  { %v2777_v7 = vpop.eup %2776 }
0x1bba   :  { %v1879_v14 = vmul.f32 %v2777_v7, %v2773_v23  ;;  %v2327_v7 = vld [vmem:[%s3550_s13 + $0xa8] sm:$0xff] }
0x1bbd   :  { %v2779_v12 = vpop.eup %2778 }
0x1bbe   :  { %v1881_v15 = vmul.f32 %v2779_v12, %v2775_v60  ;;  %v2137_v12 = vpack.c.bf16 %v2327_v7, %v2326_v6 }
0x1bc0   :  { %v1882_v18 = vpack.c.bf16 %v1881_v15, %v1879_v14  ;;  %v2328_v14 = vld [vmem:[%s3550_s13 + $0xb0] sm:$0xff]  ;;  %v2329_v15 = vld [vmem:[%s3550_s13 + $0xb8] sm:$0xff] }
0x1bc2   :  { %2628 = vmatmul.mubr.msk.bf16.vlgmr.msra.gmra.mrb[64].mxu1 %vm340_vm10, %v1882_v18  ;;  %v2138_v18 = vpack.c.bf16 %v2329_v15, %v2328_v14 }
0x1bc3   :  { %2641 = vmatprep.mubr.msk.bf16.mxu1 %vm2818_vm4, %v2817_v11  ;;  %2638 = vmatpush3.bf16.msra.mxu1 %v2045_v48 }
0x1bc4   :  { %2639 = vmatprep.subr.bf16.mxu1 %v2817_v11 }
0x1bc7   :  { %2640 = vmatpush3.bf16.msra.mxu1 %v2046_v53 }
0x1c95   :  { %v1923_v61 = vpop.f32.mrb[64].mxu1 }
0x1c96   :  { %v2629_v19 = vpop.f32.mrb[65].mxu1 }
0x1c97   :  { %v1926_v26 = vpop.f32.mrb[66].mxu1  ;;  %v2331_v19 = vld [vmem:[%s3550_s13 + $0xc8] sm:$0xff] }
0x1c98   :  { %v1930_v20 = vpack.c.bf16 %v1926_v26, %v1923_v61  ;;  %v2630_v62 = vpop.f32.mrb[67].mxu1  ;;  %v2330_v61 = vld [vmem:[%s3550_s13 + $0xc0] sm:$0xff]  ;;  %v2332_v26 = vld [vmem:[%s3550_s13 + $0xd0] sm:$0xff] }
0x1c99   :  { %v2333_v62 = vld [vmem:[%s3550_s13 + $0xd8] sm:$0xff] }
0x1c9a   :  { %2634 = vmatmul.mubr.msk.bf16.vlgmr.msra.gmra.mrb[44].mxu0 %vm292_vm5, %v1930_v20  ;;  %v2139_v20 = vpack.c.bf16 %v2331_v19, %v2330_v61 }
0x1c9b   :  { %2661 = vmatprep.mubr.msk.bf16.mxu0 %vm2818_vm4, %v2817_v11 }
0x1d6d   :  { %v1972_v22 = vpop.f32.mrb[44].mxu0 }
0x1d6e   :  { %v1979_v24 = vadd.f32 %v1972_v22, %v1807_v1  ;;  %v2635_v25 = vpop.f32.mrb[45].mxu0  ;;  %v2322_v1 = vld [vmem:[%s3550_s13 + $0x80] sm:$0xff]  ;;  %v2140_v22 = vpack.c.bf16 %v2333_v62, %v2332_v26 }
0x1d6f   :  { %v1975_v28 = vpop.f32.mrb[46].mxu0  ;;  %v2135_v2 = vpack.c.bf16 %v2323_v9, %v2322_v1  ;;  %v2335_v25 = vld [vmem:[%s3550_s13 + $0xe8] sm:$0xff]  ;;  %v2340_v26 = vld [vmem:[%s3552_s15] ss:$0 sm:$0xff] }
0x1d70   :  { %v1981_v16 = vadd.f32 %v1979_v24, %v3249_v49  ;;  %v1980_v29 = vadd.f32 %v1975_v28, %v1808_v3  ;;  %v2636_v30 = vpop.f32.mrb[47].mxu0  ;;  %v2324_v3 = vld [vmem:[%s3550_s13 + $0x90] sm:$0xff]  ;;  %v2334_v24 = vld [vmem:[%s3550_s13 + $0xe0] sm:$0xff] }
0x1d71   :  { %2646 = vmatpush3.bf16.msra.mxu0 %v2135_v2  ;;  %v2136_v5 = vpack.c.bf16 %v2325_v4, %v2324_v3  ;;  %v2336_v28 = vld [vmem:[%s3550_s13 + $0xf0] sm:$0xff]  ;;  %v2320_v30 = vld [vmem:[%s3567_s26 + $0x1] ss:$0 sm:$0xff]  ;;  %v2341_v62 = vld [vmem:[%s3553_s16] ss:$0 sm:$0xff] }
0x1d72   :  { %v3417_v17 = vadd.f32 %v2310_v27, %v1981_v16  ;;  %v1982_v31 = vadd.f32 %v1980_v29, %v3252_v52  ;;  %2647 = vmatprep.subr.bf16.mxu0 %v2817_v11  ;;  %v2337_v16 = vld [vmem:[%s3550_s13 + $0xf8] sm:$0xff] }
0x1d73   :  { %v2142_v29 = vpack.c.bf16 %v2337_v16, %v2336_v28 }
0x1d74   :  { %v3420_v32 = vadd.f32 %v2310_v27, %v1982_v31  ;;  %v1997_v33 = vsel %vm179_vm3, %v3417_v17, 0.0  ;;  %v2141_v27 = vpack.c.bf16 %v2335_v25, %v2334_v24 }
0x1d75   :  { %1998 = vadd.xlane.f32.xlu0 %v1997_v33  ;;  %2648 = vmatpush3.bf16.msra.mxu0 %v2136_v5 }
0x1d76   :  { %v2000_v35 = vsel %vm179_vm3, %v3420_v32, 0.0  ;;  %2649 = vmatprep.subr.bf16.mxu0 %v2817_v11 }
0x1d79   :  { %2001 = vadd.xlane.f32.xlu0 %v2000_v35  ;;  %2650 = vmatpush3.bf16.msra.mxu0 %v2137_v12 }
0x1d7a   :  { %2651 = vmatprep.subr.bf16.mxu0 %v2817_v11 }
0x1d7d   :  { %2652 = vmatpush3.bf16.msra.mxu0 %v2138_v18 }
0x1d7e   :  { %2653 = vmatprep.subr.bf16.mxu0 %v2817_v11 }
0x1d81   :  { %2654 = vmatpush3.bf16.msra.mxu0 %v2139_v20 }
0x1d82   :  { %2655 = vmatprep.subr.bf16.mxu0 %v2817_v11 }
0x1d85   :  { %2656 = vmatpush3.bf16.msra.mxu0 %v2140_v22 }
0x1d86   :  { %2657 = vmatprep.subr.bf16.mxu0 %v2817_v11 }
0x1d89   :  { %2658 = vmatpush3.bf16.msra.mxu0 %v2141_v27 }
0x1d8a   :  { %2659 = vmatprep.subr.bf16.mxu0 %v2817_v11 }
0x1d8d   :  { %2660 = vmatpush3.bf16.msra.mxu0 %v2142_v29 }
0x1e02   :  { %v1999_v36 = vpop.xlane.xlu0 %1998 }
0x1e03   :  { %v2003_v37 = vmul.f32 0.03125, %v1999_v36 }
0x1e05   :  { %v2005_v49 = vsub.f32 %v3417_v17, %v2003_v37 }
0x1e06   :  { %v2002_v38 = vpop.xlane.xlu0 %2001 }
0x1e07   :  { %v2004_v39 = vmul.f32 0.03125, %v2002_v38  ;;  %v2007_v40 = vmul.f32 %v2005_v49, %v2005_v49 }
0x1e09   :  { %v2006_v41 = vsub.f32 %v3420_v32, %v2004_v39  ;;  %v2009_v52 = vsel %vm179_vm3, %v2007_v40, 0.0 }
0x1e0a   :  { %2010 = vadd.xlane.f32.xlu0 %v2009_v52 }
0x1e0b   :  { %v2008_v43 = vmul.f32 %v2006_v41, %v2006_v41 }
0x1e0d   :  { %v2012_v44 = vsel %vm179_vm3, %v2008_v43, 0.0 }
0x1e0e   :  { %2013 = vadd.xlane.f32.xlu0 %v2012_v44 }
0x1e97   :  { %v2011_v54 = vpop.xlane.xlu0 %2010 }
0x1e98   :  { %v2015_v55 = vmul.f32 0.03125, %v2011_v54 }
0x1e9a   :  { %v2017_v8 = vadd.f32 1e-05, %v2015_v55 }
0x1e9b   :  { %v2014_v56 = vpop.xlane.xlu0 %2013 }
0x1e9c   :  { %2780 = vrsqrt.f32 %v2017_v8  ;;  %v2016_v57 = vmul.f32 0.03125, %v2014_v56 }
0x1e9e   :  { %v2018_v10 = vadd.f32 1e-05, %v2016_v57 }
0x1ea0   :  { %2782 = vrsqrt.f32 %v2018_v10  ;;  %v2339_v10 = vld [vmem:[%s3551_s14 + $0x1] ss:$0 sm:$0xff] }
0x1ea6   :  { %v2781_v58 = vpop.eup %2780 }
0x1ea7   :  { %v2021_v21 = vmul.f32 %v2781_v58, %v2005_v49 }
0x1ea9   :  { %v2029_v13 = vmul.f32 %v2313_v59, %v2021_v21 }
0x1eaa   :  { %v2783_v23 = vpop.eup %2782 }
0x1eab   :  { %v2022_v60 = vmul.f32 %v2783_v23, %v2006_v41  ;;  %v2037_v45 = vadd.f32 %v2314_v42, %v2029_v13 }
0x1ead   :  { %v2030_v34 = vmul.f32 %v2313_v59, %v2022_v60 }
0x1eaf   :  { %v2038_v63 = vadd.f32 %v2314_v42, %v2030_v34 }
0x1eb1   :  { %v2039_v0 = vpack.c.bf16 %v2038_v63, %v2037_v45 }
0x1eb3   :  { %2642 = vmatmul.mubr.msk.bf16.vlgmr.msra.gmra.mrb[68].mxu1 %vm179_vm3, %v2039_v0 }
0x1f86   :  { %v2092_v31 = vpop.f32.mrb[68].mxu1 }
0x1f87   :  { %v2093_v33 = vadd.f32 %v2320_v30, %v2092_v31  ;;  %v2643_v35 = vpop.f32.mrb[69].mxu1 }
0x1f88   :  { %v2095_v36 = vpop.f32.mrb[70].mxu1 }
0x1f89   :  { %v2101_v37 = vmul.f32 0.044715, %v2093_v33  ;;  %v2096_v49 = vadd.f32 %v2320_v30, %v2095_v36  ;;  %v2644_v38 = vpop.f32.mrb[71].mxu1  ;;  %v2099_v53 = vmul.f32 0.5, %v2093_v33 }
0x1f8b   :  { %v2103_v39 = vmul.f32 %v2101_v37, %v2093_v33  ;;  %v2102_v40 = vmul.f32 0.044715, %v2096_v49  ;;  %v2100_v54 = vmul.f32 0.5, %v2096_v49 }
0x1f8d   :  { %v2105_v41 = vmul.f32 %v2103_v39, %v2093_v33  ;;  %v2104_v52 = vmul.f32 %v2102_v40, %v2096_v49 }
0x1f8f   :  { %v2107_v43 = vadd.f32 %v2105_v41, %v2093_v33  ;;  %v2106_v44 = vmul.f32 %v2104_v52, %v2096_v49 }
0x1f91   :  { %v2109_v46 = vmul.f32 0.7978846, %v2107_v43  ;;  %v2108_v11 = vadd.f32 %v2106_v44, %v2096_v49 }
0x1f93   :  { %2784 = vtanh.f32 %v2109_v46  ;;  %v2110_v47 = vmul.f32 0.7978846, %v2108_v11 }
0x1f95   :  { %2786 = vtanh.f32 %v2110_v47 }
0x1f9d   :  { %v2785_v48 = vpop.eup %2784 }
0x1f9e   :  { %v2113_v50 = vadd.f32 1.0, %v2785_v48 }
0x1f9f   :  { %v2787_v51 = vpop.eup %2786 }
0x1fa0   :  { %v2114_v55 = vadd.f32 1.0, %v2787_v51  ;;  %v2115_v8 = vmul.f32 %v2113_v50, %v2099_v53 }
0x1fa2   :  { %v2116_v56 = vmul.f32 %v2114_v55, %v2100_v54 }
0x1fa4   :  { %v2117_v57 = vpack.c.bf16 %v2116_v56, %v2115_v8 }
0x1fa6   :  { %2662 = vmatmul.mubr.bf16.vlgmr.msra.gmra.mrb[48].mxu0 %v2117_v57 }
0x2079   :  { %v2185_v58 = vpop.f32.mrb[48].mxu0 }
0x207a   :  { %v2186_v21 = vadd.f32 %v2339_v10, %v2185_v58  ;;  %v2663_v59 = vpop.f32.mrb[49].mxu0 }
0x207b   :  { %v2188_v23 = vpop.f32.mrb[50].mxu0 }
0x207c   :  { %v2189_v13 = vadd.f32 %v2339_v10, %v2188_v23  ;;  %v2664_v60 = vpop.f32.mrb[51].mxu0  ;;  %v2192_v42 = vadd.f32 %v2186_v21, %v3417_v17 }
0x207e   :  { %v2196_v34 = vsel %vm179_vm3, %v2192_v42, 0.0  ;;  %v2193_v45 = vadd.f32 %v2189_v13, %v3420_v32 }
0x207f   :  { %2197 = vadd.xlane.f32.xlu1 %v2196_v34 }
0x2080   :  { %v2199_v63 = vsel %vm179_vm3, %v2193_v45, 0.0 }
0x2081   :  { %2200 = vadd.xlane.f32.xlu0 %v2199_v63 }
0x210c   :  { %v2198_v0 = vpop.xlane.xlu1 %2197 }
0x210d   :  { %v2202_v1 = vmul.f32 0.03125, %v2198_v0 }
0x210e   :  { %v2201_v9 = vpop.xlane.xlu0 %2200 }
0x210f   :  { %v2204_v2 = vsub.f32 %v2192_v42, %v2202_v1  ;;  %v2203_v3 = vmul.f32 0.03125, %v2201_v9 }
0x2111   :  { %v2205_v4 = vsub.f32 %v2193_v45, %v2203_v3  ;;  %v2206_v5 = vmul.f32 %v2204_v2, %v2204_v2 }
0x2113   :  { %v2208_v6 = vsel %vm179_vm3, %v2206_v5, 0.0  ;;  %v2207_v7 = vmul.f32 %v2205_v4, %v2205_v4 }
0x2114   :  { %2209 = vadd.xlane.f32.xlu0 %v2208_v6 }
0x2115   :  { %v2211_v17 = vsel %vm179_vm3, %v2207_v7, 0.0 }
0x2118   :  { %2212 = vadd.xlane.f32.xlu0 %v2211_v17 }
0x21a1   :  { %v2210_v12 = vpop.xlane.xlu0 %2209 }
0x21a2   :  { %v2214_v32 = vmul.f32 0.03125, %v2210_v12 }
0x21a4   :  { %v2216_v14 = vadd.f32 1e-05, %v2214_v32 }
0x21a5   :  { %v2213_v15 = vpop.xlane.xlu0 %2212 }
0x21a6   :  { %2788 = vrsqrt.f32 %v2216_v14  ;;  %v2215_v18 = vmul.f32 0.03125, %v2213_v15 }
0x21a8   :  { %v2217_v61 = vadd.f32 1e-05, %v2215_v18 }
0x21aa   :  { %2790 = vrsqrt.f32 %v2217_v61 }
0x21b0   :  { %v2789_v19 = vpop.eup %2788 }
0x21b1   :  { %v2220_v20 = vmul.f32 %v2789_v19, %v2204_v2 }
0x21b3   :  { %v2228_v22 = vmul.f32 %v2340_v26, %v2220_v20 }
0x21b4   :  { %v2791_v24 = vpop.eup %2790 }
0x21b5   :  { %v2221_v25 = vmul.f32 %v2791_v24, %v2205_v4  ;;  %v2236_v27 = vadd.f32 %v2341_v62, %v2228_v22 }
0x21b7   :  { %v2229_v28 = vmul.f32 %v2340_v26, %v2221_v25  ;;  %2238 = vst.msk [vmem:[#allocation2] sm:$0xff] %vm179_vm3, %v2236_v27 }
0x21b9   :  { %v2237_v16 = vadd.f32 %v2341_v62, %v2229_v28 }
0x21bb   :  { %2239 = vst.msk [vmem:[#allocation2 + $0x8] sm:$0xff] %vm179_vm3, %v2237_v16 }
0x21bc   :  { %2803 = shalt.err (!%p2800_p4)
}
0x21bd   :  { %s2804_s21 = scalar_lea.hbm %s3554_s17, 256 }
0x21be   :  { %p2805_p5 = scmp.ne.s32.totalorder %s3554_s17, %s2804_s21  ;;  %p2808_p6 = scmp.lt.u32.totalorder %s2804_s21, %s3554_s17 }
0x21c0   :  { %p2810_p7 = pnand %p2808_p6, %p2805_p5 }
0x21c2   :  { %2813 = shalt.err (!%p2810_p7)
}
0x21c3   :  { %s2832_s23 = smov 128   ;;  %s2833_s3 = smov 8  }
0x21c4   :  { %2251 = dma.vmem_to_hbm [thread:$0]  %s2246_s8, 256, %s3554_s17, [#allocation3], %s2832_s23, %s2832_s23, %s2833_s3  }
0x21c5   :  { %2814 = dma.done.wait [#allocation3], 256  }
0x21c6   :  { %2815 = vsyncadd [#allocation3], 4294967040 }
0x21c7   :  { %2255 = vsyncpa [#allocation3], 1 }

</bundles_post_ra>
